<compile_context>
chip_gen: v7x
topology: tpu7x:2x2x1
jax: 0.10.0
libtpu: 0.0.40
codegen_flags: <defaults>
</compile_context>

<pallas_src>
import math
import numpy as np
import jax
import jax.numpy as jnp
from jax.experimental import pallas as pl
from jax.experimental.pallas import tpu as pltpu

# ----------------------------------------------------------------------------
# Irreps configuration (synthetic but fully e3nn-consistent for l <= 1)
# ----------------------------------------------------------------------------
# (mul, l, parity)
IN_IRREPS  = [(8, 0, 1), (4, 1, -1)]     # "8x0e + 4x1o"
SH_IRREPS  = [(1, 0, 1), (1, 1, -1)]     # "1x0e + 1x1o"
OUT_IRREPS = [(8, 0, 1), (4, 1, -1)]     # "8x0e + 4x1o"

D_PAIR    = 32
FC_FACTOR = 1
N_EDGES   = 256
TILE_N    = 128   # grid=2 at N=256 -> both v7x TCs; matches v5e MXU. Use 256-1024 for big N on v5e/v6e.


def _irreps_dim(irreps):
    return sum(mul * (2 * l + 1) for mul, l, _ in irreps)


def _irreps_offsets(irreps):
    offs, o = [], 0
    for mul, l, _ in irreps:
        offs.append(o)
        o += mul * (2 * l + 1)
    return offs


def _wigner_3j_small(l1, l2, l3):
    """e3nn-convention Wigner-3j for the l<=1, non-(1,1,1) cases used here."""
    if (l1, l2, l3) == (0, 0, 0):
        return np.ones((1, 1, 1), dtype=np.float64)
    if l3 == 0 and l1 == l2:
        return np.eye(2 * l1 + 1)[:, :, None] / math.sqrt(2 * l1 + 1)
    if l2 == 0 and l1 == l3:
        return np.eye(2 * l1 + 1)[:, None, :] / math.sqrt(2 * l1 + 1)
    if l1 == 0 and l2 == l3:
        return np.eye(2 * l2 + 1)[None, :, :] / math.sqrt(2 * l2 + 1)
    raise NotImplementedError(f"wigner_3j({l1},{l2},{l3}) not needed/implemented")


def build_tp_basis():
    """Dense basis B[p, i, j, k] reproducing e3nn FullyConnectedTensorProduct
    (shared_weights=False, irrep_normalization='component',
     path_normalization='element')."""
    I = _irreps_dim(IN_IRREPS)
    J = _irreps_dim(SH_IRREPS)
    K = _irreps_dim(OUT_IRREPS)
    off1 = _irreps_offsets(IN_IRREPS)
    off2 = _irreps_offsets(SH_IRREPS)
    offo = _irreps_offsets(OUT_IRREPS)

    # all allowed uvw instructions (selection rules on l and parity)
    instructions = []
    for i1, (m1, l1, p1) in enumerate(IN_IRREPS):
        for i2, (m2, l2, p2) in enumerate(SH_IRREPS):
            for io, (mo, lo, po) in enumerate(OUT_IRREPS):
                if abs(l1 - l2) <= lo <= l1 + l2 and p1 * p2 == po:
                    instructions.append((i1, i2, io))

    def num_elements(ins):                      # 'uvw' connection mode
        return IN_IRREPS[ins[0]][0] * SH_IRREPS[ins[1]][0]

    weight_numel = sum(IN_IRREPS[a][0] * SH_IRREPS[b][0] * OUT_IRREPS[c][0]
                       for a, b, c in instructions)

    B = np.zeros((weight_numel, I, J, K), dtype=np.float64)
    woff = 0
    for ins in instructions:
        i1, i2, io = ins
        m1, l1, _ = IN_IRREPS[i1]
        m2, l2, _ = SH_IRREPS[i2]
        mo, lo, _ = OUT_IRREPS[io]
        d1, d2, d3 = 2 * l1 + 1, 2 * l2 + 1, 2 * lo + 1

        alpha = float(d3)                       # irrep_normalization='component'
        x = sum(num_elements(j) for j in instructions if j[2] == io)  # 'element'
        coef = math.sqrt(alpha / x)

        C = _wigner_3j_small(l1, l2, lo)
        for u in range(m1):
            for v in range(m2):
                for w in range(mo):
                    p = woff + (u * m2 + v) * mo + w   # e3nn flat weight layout
                    for a in range(d1):
                        for b in range(d2):
                            for c in range(d3):
                                val = C[a, b, c]
                                if val != 0.0:
                                    B[p,
                                      off1[i1] + u * d1 + a,
                                      off2[i2] + v * d2 + b,
                                      offo[io] + w * d3 + c] += coef * val
        woff += m1 * m2 * mo
    return B, weight_numel


def build_compact_tp(B4, lane=128):
    """Compress the dense basis B[p,i,j,k] into MXU-friendly operands.

    For every (p, k) pair with a nonzero basis block allocate one compact column c:
        Bc[j, i, c] = B[p, i, j, k]      per-j basis slab   (J, I, C_pad)
        R[p, c]     = 1                  weight expansion   (P, C_pad)  (folded offline)
        S[c, k]     = 1                  output scatter     (C_pad, K_pad)
    so that  ((sum_j (x1 * x2[:, j]) @ Bc[j]) * (w @ R)) @ S
    equals   sum_{p,i,j} w[n,p] B[p,i,j,k] x1[n,i] x2[n,j].
    Exploits the l<=1 block sparsity (240 live columns vs 20*144=2880 dense).
    """
    P, I, J, K = B4.shape
    cols = [(p, k) for p in range(P) for k in range(K)
            if np.any(B4[p, :, :, k] != 0.0)]
    C = len(cols)
    C_PAD = ((C + lane - 1) // lane) * lane
    K_PAD = ((K + lane - 1) // lane) * lane

    Bc = np.zeros((J, I, C_PAD), dtype=np.float32)
    R = np.zeros((P, C_PAD), dtype=np.float32)
    S = np.zeros((C_PAD, K_PAD), dtype=np.float32)
    for c, (p, k) in enumerate(cols):
        Bc[:, :, c] = B4[p, :, :, k].T
        R[p, c] = 1.0
        S[c, k] = 1.0
    return jnp.asarray(Bc), jnp.asarray(R), jnp.asarray(S), C_PAD, K_PAD


def fold_params(params, r_mat):
    """Offline algebraic folds (exact in f32 up to associativity):
       * LayerNorm affine into fc1:  w1' = gamma.T * w1 ; b1' = beta @ w1 + b1
       * one-hot weight expansion R into fc2:  w2R = w2 @ R ; b2R = b2 @ R
    """
    w1p = params["gamma"].T * params["w1"]                       # (D, H)
    b1p = params["beta"] @ params["w1"] + params["b1"]           # (1, H)
    w2r = params["w2"] @ r_mat                                   # (H, C_pad)
    b2r = params["b2"] @ r_mat                                   # (1, C_pad)
    return {"w1p": w1p, "b1p": b1p, "w2r": w2r, "b2r": b2r}


# ----------------------------------------------------------------------------
# Pallas kernel: fc(edge_attr) -> tensor product, all matmuls, all in VMEM
# ----------------------------------------------------------------------------
def tp_conv_kernel(attr1_ref, attr2_ref, edge_ref,
                   w1_ref, b1_ref, w2r_ref, b2r_ref,
                   basis_ref, s_ref, out_ref):
    # ---- fc(edge_attr): LayerNorm (affine folded into fc1) -> Linear -> ReLU
    #      -> (Dropout = inference identity) -> Linear (R folded in)
    # TODO(synk): dropout is treated as inference-mode identity (no RNG dropout mask).
    x = edge_ref[...]
    mu = jnp.mean(x, axis=-1, keepdims=True)
    var = jnp.mean(x * x, axis=-1, keepdims=True) - mu * mu      # one-pass biased var (PyTorch LN)
    xn = (x - mu) * jax.lax.rsqrt(var + 1e-5)
    h = jnp.dot(xn, w1_ref[...], preferred_element_type=jnp.float32) + b1_ref[...]
    h = jnp.maximum(h, 0.0)
    # fc weights already expanded onto the compact columns (R folded into w2/b2)
    w_exp = jnp.dot(h, w2r_ref[...], preferred_element_type=jnp.float32) + b2r_ref[...]  # (T, C)

    # ---- tensor product, path-compact all-MXU formulation
    x1 = attr1_ref[...]                                          # (T, I)
    x2 = attr2_ref[...]                                          # (T, J)
    J = x2.shape[1]
    # m[n,c] = sum_{i,j} Bc[j,i,c] * x1[n,i] * x2[n,j]  as a sum of J matmuls
    m = jnp.dot(x1 * x2[:, 0:1], basis_ref[0],
                preferred_element_type=jnp.float32)              # (T, C)
    for j in range(1, J):
        m = m + jnp.dot(x1 * x2[:, j:j + 1], basis_ref[j],
                        preferred_element_type=jnp.float32)
    # one-hot scatter/accumulate into the lane-dense padded output
    out_ref[...] = jnp.dot(m * w_exp, s_ref[...],
                           preferred_element_type=jnp.float32)   # (T, K_pad)


def tensor_product_conv(attr1, attr2, edge_attr, fparams, basis_c, s_mat):
    """Returns the lane-dense padded output (N, K_pad); the first K columns are
    the flattened output irreps.  The consumer should slice (or better, consume
    padded) -- no extra XLA slice pass is inserted here."""
    N, I = attr1.shape
    J = attr2.shape[1]
    D = edge_attr.shape[1]
    H = fparams["w1p"].shape[1]
    C = fparams["w2r"].shape[1]
    K_PAD = s_mat.shape[1]
    assert N % TILE_N == 0   # TODO(synk): ragged edge counts would need a masked tail tile.

    grid = (N // TILE_N,)
    # Constant (broadcast) inputs: index_map is constant, so Pallas does not
    # re-DMA them per grid step; total constant footprint is ~260 KiB f32.
    bc2 = lambda shape: pl.BlockSpec(shape, lambda i: (0, 0))

    out_padded = pl.pallas_call(
        tp_conv_kernel,
        out_shape=jax.ShapeDtypeStruct((N, K_PAD), jnp.float32),
        grid_spec=pltpu.PrefetchScalarGridSpec(
            num_scalar_prefetch=0,
            grid=grid,
            in_specs=[
                pl.BlockSpec((TILE_N, I), lambda i: (i, 0)),     # attr1
                pl.BlockSpec((TILE_N, J), lambda i: (i, 0)),     # attr2
                pl.BlockSpec((TILE_N, D), lambda i: (i, 0)),     # edge_attr
                bc2((D, H)),                                     # fc1 weight (LN affine folded)
                bc2((1, H)),                                     # fc1 bias   (LN affine folded)
                bc2((H, C)),                                     # fc2 weight @ R
                bc2((1, C)),                                     # fc2 bias   @ R
                pl.BlockSpec((J, I, C), lambda i: (0, 0, 0)),    # compact basis Bc (J,I,C)
                bc2((C, K_PAD)),                                 # output-scatter one-hot S
            ],
            out_specs=pl.BlockSpec((TILE_N, K_PAD), lambda i: (i, 0)),   # lane-dense output
        ),
        compiler_params=pltpu.CompilerParams(
            dimension_semantics=("parallel",)),
    )(attr1, attr2, edge_attr,
      fparams["w1p"], fparams["b1p"], fparams["w2r"], fparams["b2r"],
      basis_c, s_mat)
    return out_padded


# ----------------------------------------------------------------------------
# Pure-JAX reference (same math as the PyTorch module, no Pallas) for validation
# ----------------------------------------------------------------------------
def reference(attr1, attr2, edge_attr, params, B4):
    x = edge_attr
    mu = x.mean(-1, keepdims=True)
    var = ((x - mu) ** 2).mean(-1, keepdims=True)
    xn = (x - mu) / jnp.sqrt(var + 1e-5) * params["gamma"] + params["beta"]
    h = jax.nn.relu(xn @ params["w1"] + params["b1"])
    w = h @ params["w2"] + params["b2"]
    return jnp.einsum("np,pijk,ni,nj->nk", w, B4, attr1, attr2)


if __name__ == "__main__":
    B4_np, weight_numel = build_tp_basis()
    I = _irreps_dim(IN_IRREPS)
    J = _irreps_dim(SH_IRREPS)
    K = _irreps_dim(OUT_IRREPS)
    P = weight_numel
    H = FC_FACTOR * D_PAIR

    B4_np32 = B4_np.astype(np.float32)
    basis_c, r_mat, s_mat, C_PAD, K_PAD = build_compact_tp(B4_np32)
    B4 = jnp.asarray(B4_np32)

    key = jax.random.PRNGKey(0)
    k1, k2, k3, k4, k5, k6, k7, k8, k9 = jax.random.split(key, 9)

    # deterministic synthetic parameters (init='normal' analogue); non-trivial
    # gamma/beta so the offline LN-affine fold is actually exercised/validated
    params = {
        "gamma": 1.0 + 0.1 * jax.random.normal(k8, (1, D_PAIR), jnp.float32),
        "beta": 0.05 * jax.random.normal(k9, (1, D_PAIR), jnp.float32),
        "w1": jax.random.normal(k1, (D_PAIR, H), jnp.float32) / math.sqrt(D_PAIR),
        "b1": 0.01 * jax.random.normal(k2, (1, H), jnp.float32),
        "w2": jax.random.normal(k3, (H, P), jnp.float32) / math.sqrt(H),
        "b2": 0.01 * jax.random.normal(k4, (1, P), jnp.float32),
    }
    fparams = fold_params(params, r_mat)

    attr1 = jax.random.normal(k5, (N_EDGES, I), jnp.float32)
    attr2 = jax.random.normal(k6, (N_EDGES, J), jnp.float32)
    edge_attr = jax.random.normal(k7, (N_EDGES, D_PAIR), jnp.float32)

    out_padded = tensor_product_conv(attr1, attr2, edge_attr, fparams, basis_c, s_mat)
    out_padded = jax.block_until_ready(out_padded)
    out = out_padded[:, :K]            # consumer-side view of the lane-dense buffer

    ref = reference(attr1, attr2, edge_attr, params, B4)
    np.testing.assert_allclose(np.asarray(out), np.asarray(ref), rtol=1e-3, atol=1e-3)

    print("KERNEL_OK")
</pallas_src>

<mosaic_0001>
module attributes {stable_mosaic.version = 11 : i64} {
  func.func @tp_conv_kernel(%arg0: i32, %arg1: memref<128x20xf32, #tpu.memory_space<vmem>>, %arg2: memref<128x4xf32, #tpu.memory_space<vmem>>, %arg3: memref<128x32xf32, #tpu.memory_space<vmem>>, %arg4: memref<32x32xf32, #tpu.memory_space<vmem>>, %arg5: memref<1x32xf32, #tpu.memory_space<vmem>>, %arg6: memref<32x256xf32, #tpu.memory_space<vmem>>, %arg7: memref<1x256xf32, #tpu.memory_space<vmem>>, %arg8: memref<4x20x256xf32, #tpu.memory_space<vmem>>, %arg9: memref<256x128xf32, #tpu.memory_space<vmem>>, %arg10: memref<128x128xf32, #tpu.memory_space<vmem>>) attributes {dimension_semantics = [#tpu.dimension_semantics<parallel>], iteration_bounds = array<i64: 2>, scalar_prefetch = 0 : i64, scratch_operands = 0 : i64, tpu.core_type = #tpu.core_type<tc>, window_params = [{transform_indices = @transform_0, window_bounds = array<i64: 128, 20>}, {transform_indices = @transform_1, window_bounds = array<i64: 128, 4>}, {transform_indices = @transform_2, window_bounds = array<i64: 128, 32>}, {pipeline_mode = #tpu.pipeline_mode<synchronous>, transform_indices = @transform_3, window_bounds = array<i64: 32, 32>}, {pipeline_mode = #tpu.pipeline_mode<synchronous>, transform_indices = @transform_4, window_bounds = array<i64: 1, 32>}, {pipeline_mode = #tpu.pipeline_mode<synchronous>, transform_indices = @transform_5, window_bounds = array<i64: 32, 256>}, {pipeline_mode = #tpu.pipeline_mode<synchronous>, transform_indices = @transform_6, window_bounds = array<i64: 1, 256>}, {pipeline_mode = #tpu.pipeline_mode<synchronous>, transform_indices = @transform_7, window_bounds = array<i64: 4, 20, 256>}, {pipeline_mode = #tpu.pipeline_mode<synchronous>, transform_indices = @transform_8, window_bounds = array<i64: 256, 128>}, {transform_indices = @transform_9, window_bounds = array<i64: 128, 128>}]} {
    %c0 = arith.constant 0 : index
    %c0_0 = arith.constant 0 : index
    %0 = vector.load %arg3[%c0, %c0_0] : memref<128x32xf32, #tpu.memory_space<vmem>>, vector<128x32xf32>
    %cst = arith.constant dense<0.000000e+00> : vector<128xf32>
    %1 = vector.multi_reduction <add>, %0, %cst [1] : vector<128x32xf32> to vector<128xf32>
    %2 = vector.shape_cast %1 : vector<128xf32> to vector<128x1xf32>
    %cst_1 = arith.constant 3.200000e+01 : f32
    %3 = vector.broadcast %cst_1 : f32 to vector<128x1xf32>
    %4 = arith.divf %2, %3 : vector<128x1xf32>
    %5 = arith.mulf %0, %0 : vector<128x32xf32>
    %cst_2 = arith.constant dense<0.000000e+00> : vector<128xf32>
    %6 = vector.multi_reduction <add>, %5, %cst_2 [1] : vector<128x32xf32> to vector<128xf32>
    %7 = vector.shape_cast %6 : vector<128xf32> to vector<128x1xf32>
    %cst_3 = arith.constant 3.200000e+01 : f32
    %8 = vector.broadcast %cst_3 : f32 to vector<128x1xf32>
    %9 = arith.divf %7, %8 : vector<128x1xf32>
    %10 = arith.mulf %4, %4 : vector<128x1xf32>
    %11 = arith.subf %9, %10 : vector<128x1xf32>
    %12 = vector.broadcast %4 : vector<128x1xf32> to vector<128x32xf32>
    %13 = arith.subf %0, %12 : vector<128x32xf32>
    %cst_4 = arith.constant 9.99999974E-6 : f32
    %14 = vector.broadcast %cst_4 : f32 to vector<128x1xf32>
    %15 = arith.addf %11, %14 : vector<128x1xf32>
    %16 = math.rsqrt %15 : vector<128x1xf32>
    %17 = vector.broadcast %16 : vector<128x1xf32> to vector<128x32xf32>
    %18 = arith.mulf %13, %17 : vector<128x32xf32>
    %c0_5 = arith.constant 0 : index
    %c0_6 = arith.constant 0 : index
    %19 = vector.load %arg4[%c0_5, %c0_6] : memref<32x32xf32, #tpu.memory_space<vmem>>, vector<32x32xf32>
    %cst_7 = arith.constant dense<0.000000e+00> : vector<128x32xf32>
    %20 = tpu.matmul %18, %19, %cst_7 {dimension_numbers = #tpu.dot_dimension_numbers<[1], [0], [0], [1], [0, 0, 1, 1], [], []>} : vector<128x32xf32>, vector<32x32xf32>, vector<128x32xf32> -> vector<128x32xf32>
    %c0_8 = arith.constant 0 : index
    %c0_9 = arith.constant 0 : index
    %21 = vector.load %arg5[%c0_8, %c0_9] : memref<1x32xf32, #tpu.memory_space<vmem>>, vector<1x32xf32>
    %22 = vector.broadcast %21 : vector<1x32xf32> to vector<128x32xf32>
    %23 = arith.addf %20, %22 : vector<128x32xf32>
    %cst_10 = arith.constant 0.000000e+00 : f32
    %24 = vector.broadcast %cst_10 : f32 to vector<128x32xf32>
    %25 = arith.maximumf %23, %24 : vector<128x32xf32>
    %c0_11 = arith.constant 0 : index
    %c0_12 = arith.constant 0 : index
    %26 = vector.load %arg6[%c0_11, %c0_12] : memref<32x256xf32, #tpu.memory_space<vmem>>, vector<32x256xf32>
    %cst_13 = arith.constant dense<0.000000e+00> : vector<128x256xf32>
    %27 = tpu.matmul %25, %26, %cst_13 {dimension_numbers = #tpu.dot_dimension_numbers<[1], [0], [0], [1], [0, 0, 1, 1], [], []>} : vector<128x32xf32>, vector<32x256xf32>, vector<128x256xf32> -> vector<128x256xf32>
    %c0_14 = arith.constant 0 : index
    %c0_15 = arith.constant 0 : index
    %28 = vector.load %arg7[%c0_14, %c0_15] : memref<1x256xf32, #tpu.memory_space<vmem>>, vector<1x256xf32>
    %29 = vector.broadcast %28 : vector<1x256xf32> to vector<128x256xf32>
    %30 = arith.addf %27, %29 : vector<128x256xf32>
    %c0_16 = arith.constant 0 : index
    %c0_17 = arith.constant 0 : index
    %31 = vector.load %arg1[%c0_16, %c0_17] : memref<128x20xf32, #tpu.memory_space<vmem>>, vector<128x20xf32>
    %c0_18 = arith.constant 0 : index
    %c0_19 = arith.constant 0 : index
    %32 = vector.load %arg2[%c0_18, %c0_19] : memref<128x4xf32, #tpu.memory_space<vmem>>, vector<128x4xf32>
    %33 = vector.extract_strided_slice %32 {offsets = [0, 0], sizes = [128, 1], strides = [1, 1]} : vector<128x4xf32> to vector<128x1xf32>
    %34 = vector.broadcast %33 : vector<128x1xf32> to vector<128x20xf32>
    %35 = arith.mulf %31, %34 : vector<128x20xf32>
    %c0_20 = arith.constant 0 : index
    %c0_21 = arith.constant 0 : index
    %c0_22 = arith.constant 0 : index
    %36 = vector.load %arg8[%c0_20, %c0_21, %c0_22] : memref<4x20x256xf32, #tpu.memory_space<vmem>>, vector<1x20x256xf32>
    %37 = vector.shape_cast %36 : vector<1x20x256xf32> to vector<20x256xf32>
    %cst_23 = arith.constant dense<0.000000e+00> : vector<128x256xf32>
    %38 = tpu.matmul %35, %37, %cst_23 {dimension_numbers = #tpu.dot_dimension_numbers<[1], [0], [0], [1], [0, 0, 1, 1], [], []>} : vector<128x20xf32>, vector<20x256xf32>, vector<128x256xf32> -> vector<128x256xf32>
    %39 = vector.extract_strided_slice %32 {offsets = [0, 1], sizes = [128, 1], strides = [1, 1]} : vector<128x4xf32> to vector<128x1xf32>
    %40 = vector.broadcast %39 : vector<128x1xf32> to vector<128x20xf32>
    %41 = arith.mulf %31, %40 : vector<128x20xf32>
    %c1 = arith.constant 1 : index
    %c0_24 = arith.constant 0 : index
    %c0_25 = arith.constant 0 : index
    %42 = vector.load %arg8[%c1, %c0_24, %c0_25] : memref<4x20x256xf32, #tpu.memory_space<vmem>>, vector<1x20x256xf32>
    %43 = vector.shape_cast %42 : vector<1x20x256xf32> to vector<20x256xf32>
    %cst_26 = arith.constant dense<0.000000e+00> : vector<128x256xf32>
    %44 = tpu.matmul %41, %43, %cst_26 {dimension_numbers = #tpu.dot_dimension_numbers<[1], [0], [0], [1], [0, 0, 1, 1], [], []>} : vector<128x20xf32>, vector<20x256xf32>, vector<128x256xf32> -> vector<128x256xf32>
    %45 = arith.addf %38, %44 : vector<128x256xf32>
    %46 = vector.extract_strided_slice %32 {offsets = [0, 2], sizes = [128, 1], strides = [1, 1]} : vector<128x4xf32> to vector<128x1xf32>
    %47 = vector.broadcast %46 : vector<128x1xf32> to vector<128x20xf32>
    %48 = arith.mulf %31, %47 : vector<128x20xf32>
    %c2 = arith.constant 2 : index
    %c0_27 = arith.constant 0 : index
    %c0_28 = arith.constant 0 : index
    %49 = vector.load %arg8[%c2, %c0_27, %c0_28] : memref<4x20x256xf32, #tpu.memory_space<vmem>>, vector<1x20x256xf32>
    %50 = vector.shape_cast %49 : vector<1x20x256xf32> to vector<20x256xf32>
    %cst_29 = arith.constant dense<0.000000e+00> : vector<128x256xf32>
    %51 = tpu.matmul %48, %50, %cst_29 {dimension_numbers = #tpu.dot_dimension_numbers<[1], [0], [0], [1], [0, 0, 1, 1], [], []>} : vector<128x20xf32>, vector<20x256xf32>, vector<128x256xf32> -> vector<128x256xf32>
    %52 = arith.addf %45, %51 : vector<128x256xf32>
    %53 = vector.extract_strided_slice %32 {offsets = [0, 3], sizes = [128, 1], strides = [1, 1]} : vector<128x4xf32> to vector<128x1xf32>
    %54 = vector.broadcast %53 : vector<128x1xf32> to vector<128x20xf32>
    %55 = arith.mulf %31, %54 : vector<128x20xf32>
    %c3 = arith.constant 3 : index
    %c0_30 = arith.constant 0 : index
    %c0_31 = arith.constant 0 : index
    %56 = vector.load %arg8[%c3, %c0_30, %c0_31] : memref<4x20x256xf32, #tpu.memory_space<vmem>>, vector<1x20x256xf32>
    %57 = vector.shape_cast %56 : vector<1x20x256xf32> to vector<20x256xf32>
    %cst_32 = arith.constant dense<0.000000e+00> : vector<128x256xf32>
    %58 = tpu.matmul %55, %57, %cst_32 {dimension_numbers = #tpu.dot_dimension_numbers<[1], [0], [0], [1], [0, 0, 1, 1], [], []>} : vector<128x20xf32>, vector<20x256xf32>, vector<128x256xf32> -> vector<128x256xf32>
    %59 = arith.addf %52, %58 : vector<128x256xf32>
    %60 = arith.mulf %59, %30 : vector<128x256xf32>
    %c0_33 = arith.constant 0 : index
    %c0_34 = arith.constant 0 : index
    %61 = vector.load %arg9[%c0_33, %c0_34] : memref<256x128xf32, #tpu.memory_space<vmem>>, vector<256x128xf32>
    %cst_35 = arith.constant dense<0.000000e+00> : vector<128x128xf32>
    %62 = tpu.matmul %60, %61, %cst_35 {dimension_numbers = #tpu.dot_dimension_numbers<[1], [0], [0], [1], [0, 0, 1, 1], [], []>} : vector<128x256xf32>, vector<256x128xf32>, vector<128x128xf32> -> vector<128x128xf32>
    %c0_36 = arith.constant 0 : index
    %c0_37 = arith.constant 0 : index
    %63 = vector.load %arg10[%c0_36, %c0_37] : memref<128x128xf32, #tpu.memory_space<vmem>>, vector<128x128xf32>
    tpu.vector_store %arg10[%c0_36, %c0_37], %62 {strides = array<i32>} : memref<128x128xf32, #tpu.memory_space<vmem>>, vector<128x128xf32>,
    return
  }
  func.func @transform_0(%arg0: i32) -> (i32, i32) {
    %c0_i32 = arith.constant 0 : i32
    %c0_i32_0 = arith.constant 0 : i32
    return %arg0, %c0_i32 : i32, i32
  }
  func.func @transform_1(%arg0: i32) -> (i32, i32) {
    %c0_i32 = arith.constant 0 : i32
    %c0_i32_0 = arith.constant 0 : i32
    return %arg0, %c0_i32 : i32, i32
  }
  func.func @transform_2(%arg0: i32) -> (i32, i32) {
    %c0_i32 = arith.constant 0 : i32
    %c0_i32_0 = arith.constant 0 : i32
    return %arg0, %c0_i32 : i32, i32
  }
  func.func @transform_3(%arg0: i32) -> (i32, i32) {
    %c0_i32 = arith.constant 0 : i32
    %c0_i32_0 = arith.constant 0 : i32
    %c0_i32_1 = arith.constant 0 : i32
    return %c0_i32, %c0_i32_0 : i32, i32
  }
  func.func @transform_4(%arg0: i32) -> (i32, i32) {
    %c0_i32 = arith.constant 0 : i32
    %c0_i32_0 = arith.constant 0 : i32
    %c0_i32_1 = arith.constant 0 : i32
    return %c0_i32, %c0_i32_0 : i32, i32
  }
  func.func @transform_5(%arg0: i32) -> (i32, i32) {
    %c0_i32 = arith.constant 0 : i32
    %c0_i32_0 = arith.constant 0 : i32
    %c0_i32_1 = arith.constant 0 : i32
    return %c0_i32, %c0_i32_0 : i32, i32
  }
  func.func @transform_6(%arg0: i32) -> (i32, i32) {
    %c0_i32 = arith.constant 0 : i32
    %c0_i32_0 = arith.constant 0 : i32
    %c0_i32_1 = arith.constant 0 : i32
    return %c0_i32, %c0_i32_0 : i32, i32
  }
  func.func @transform_7(%arg0: i32) -> (i32, i32, i32) {
    %c0_i32 = arith.constant 0 : i32
    %c0_i32_0 = arith.constant 0 : i32
    %c0_i32_1 = arith.constant 0 : i32
    %c0_i32_2 = arith.constant 0 : i32
    return %c0_i32, %c0_i32_0, %c0_i32_1 : i32, i32, i32
  }
  func.func @transform_8(%arg0: i32) -> (i32, i32) {
    %c0_i32 = arith.constant 0 : i32
    %c0_i32_0 = arith.constant 0 : i32
    %c0_i32_1 = arith.constant 0 : i32
    return %c0_i32, %c0_i32_0 : i32, i32
  }
  func.func @transform_9(%arg0: i32) -> (i32, i32) {
    %c0_i32 = arith.constant 0 : i32
    %c0_i32_0 = arith.constant 0 : i32
    return %arg0, %c0_i32 : i32, i32
  }
}

</mosaic_0001>

<bundles_post_ra>
// kernel: tpu_custom_call.1
= control target key start
LH: loop header
LB: loop body
LE: loop exit
PB: predicated region body
PF: predicated region fallthrough
CT: control target
= control target key end

     0   :  { %14 = vsyncpa [#allocation3], 0  ;;  %s4658_s0 = inlined_call_operand.vmem [shape: f32[256,20], index: 0, kind: input, shape index: {}]   ;;  %s4659_s1 = inlined_call_operand.vmem [shape: f32[256,4], index: 1, kind: input, shape index: {}]   ;;  %s4660_s2 = inlined_call_operand.vmem [shape: f32[256,32], index: 2, kind: input, shape index: {}]   ;;  %s4661_s3 = inlined_call_operand.vmem [shape: f32[32,32], index: 3, kind: input, shape index: {}]   ;;  %s4662_s4 = inlined_call_operand.vmem [shape: f32[1,32], index: 4, kind: input, shape index: {}]   ;;  %s4663_s5 = inlined_call_operand.vmem [shape: f32[32,256], index: 5, kind: input, shape index: {}]   ;;  %s4664_s6 = inlined_call_operand.vmem [shape: f32[1,256], index: 6, kind: input, shape index: {}]   ;;  %s4665_s7 = inlined_call_operand.vmem [shape: f32[4,20,256], index: 7, kind: input, shape index: {}]   ;;  %s4666_s8 = inlined_call_operand.vmem [shape: f32[256,128], index: 8, kind: input, shape index: {}]   ;;  %s4667_s9 = inlined_call_operand.hbm [shape: f32[256,128], index: 9, kind: output, shape index: {}]  }
   0x1   :  { %16 = vsyncpa [#allocation3 + $0x1], 0  ;;  %s3391_s30 = smov 0   ;;  %s3393_s10 = smov 0  }
   0x2   :  { %s3395_s11 = smov 0   ;;  %s3397_s12 = smov 0  }
   0x3 LB: > { %s3412_s13 = sadd.s32 4294967295, %s3331_s12   ;;  %s2731_s14 = sadd.s32 4294967294, %s3331_s12   ;;  %s3331_s12 = sphi %s3397_s12, %s4705_s12   ;;  %s3327_s11 = sphi %s3395_s11, %s4704_s11   ;;  %s3323_s10 = sphi %s3393_s10, %s4703_s10   ;;  %s3319_s30 = sphi %s3391_s30, %s4702_s30  }
   0x4   : > { %s3416_s15 = sadd.s32 1, %s3331_s12   ;;  %s233_s16 = sadd.s32 1, %s3327_s11 }
   0x5   : > { %s230_s17 = ssub.s32 %s3331_s12, %s3416_s15  ;;  %p243_p0 = scmp.ne.s32.totalorder %s3327_s11, %s3323_s10 }
   0x6   : > { %p231_p1 = scmp.eq.s32.totalorder %s230_s17, 0  ;;  %p244_p2 = scmp.eq.s32.totalorder %s3412_s13, 1 }
   0x7   : > { %p249_p3 = scmp.ne.s32.totalorder %s3323_s10, %s3319_s30  ;;  %p250_p4 = scmp.eq.s32.totalorder %s2731_s14, 1 }
   0x8   : > { %s3427_s18 = scalar_select %p231_p1, %s3327_s11, %s233_s16  }
   0x9   : > { %p3429_p5 = por %p244_p2, %p243_p0  ;;  %p3433_p6 = por %p250_p4, %p249_p3 }
   0xa   : > { %p2734_p7 = scmp.ge.s32.totalorder %s3331_s12, 1  ;;  %p313_p8 = scmp.lt.s32.totalorder %s3331_s12, 3 }
   0xc   : > { %p314_p9 = pnand %p2734_p7, %p313_p8 }
   0xe   : > { %317 = sbr.rel (%p314_p9) target bundleno = 985 (0x3d9), region = 56 }
  0x15   : > { %s2736_s21 = sshll.u32 %s3412_s13, 4  ;;  %v3333_v0 = vmov 0   ;;  %vm394_vm0 = vcmask 261120   ;;  %v636_v35 = vld [vmem:[%s4661_s3] sm:$0xff]  ;;  %v637_v36 = vld [vmem:[%s4661_s3 + $0x8] sm:$0xff]  ;;  %v638_v43 = vld [vmem:[%s4661_s3 + $0x10] sm:$0xff] }
  0x16   : > { %p360_p10 = scmp.lt.s32.totalorder %s2736_s21, 31  ;;  %3213 = vset.pattern.permute.xlu0 %v3333_v0  ;;  %3214 = vset.pattern.permute.xlu1 %v3333_v0  ;;  %v3003_v39 = vpack.c.bf16 %v637_v36, %v636_v35  ;;  %v639_v44 = vld [vmem:[%s4661_s3 + $0x18] sm:$0xff]  ;;  %vm1355_vm1 = vcmask 1043456   ;;  %vm1306_vm2 = vcmask 162816   ;;  %s356_s17 = sand.u32 1, %s3323_s10  }
  0x17   : > { %v3007_v46 = vpack.c.bf16 %v639_v44, %v638_v43  ;;  %s2735_s23 = sshll.u32 %s356_s17, 7  ;;  %s4617_s28 = scalar_lea.sflag [#allocation3], %s356_s17 }
  0x18   : > { %s4707_s21 = smov (!%p360_p10, %s2736_s21), 31  ;;  %3004 = vmatprep.subr.bf16.mxu0 %v3003_v39  ;;  %3067 = vmatprep.subr.bf16.mxu1 %v3003_v39  ;;  %s4588_s24 = scalar_lea.vmem [#allocation2], %s2735_s23 }
  0x19   : > { %s3440_s22 = sshll.u32 %s4707_s21, 3  ;;  %3006 = vmatpush3.bf16.msra.mxu0 %v3003_v39  ;;  %3069 = vmatpush3.bf16.msra.mxu1 %v3003_v39  ;;  %s3338_s29 = smov [#allocation2]  }
  0x1a   : > { %s3446_s25 = scalar_lea.vmem %s4660_s2, %s3440_s22  ;;  %3008 = vmatprep.subr.bf16.mxu0 %v3007_v46  ;;  %3068 = vmatprep.subr.bf16.mxu1 %v3007_v46  ;;  %s3829_s21 = scalar_lea.vmem %s4658_s0, %s3440_s22 }
  0x1b   : > { %v3449_v1 = vld [vmem:[%s3446_s25] sm:$0xff]  ;;  %v3452_v2 = vld [vmem:[%s3446_s25 + $0x8] sm:$0xff]  ;;  %v3464_v8 = vld [vmem:[%s3446_s25 + $0x10] sm:$0xff]  ;;  %s3273_s14 = sshll.u32 %s3338_s29, 4  ;;  %s3274_s14 = int_to_ptr.vmem [resolvable:$false] %s3273_s14 }
  0x1c   : > { %v395_v3 = vsel %vm394_vm0, %v3449_v1, 0.0  ;;  %v460_v4 = vmul.f32 %v3449_v1, %v3449_v1  ;;  %v461_v5 = vmul.f32 %v3452_v2, %v3452_v2  ;;  %v398_v7 = vsel %vm394_vm0, %v3452_v2, 0.0  ;;  %v3468_v10 = vld [vmem:[%s3446_s25 + $0x18] sm:$0xff]  ;;  %v3480_v16 = vld [vmem:[%s3446_s25 + $0x20] sm:$0xff]  ;;  %v3484_v18 = vld [vmem:[%s3446_s25 + $0x28] sm:$0xff]  ;;  %s3275_s16 = scalar_lea.vmem %s3274_s14, 4096 }
  0x1d   : > { %396 = vadd.xlane.f32.xlu0 %v395_v3  ;;  %v401_v11 = vsel %vm394_vm0, %v3464_v8, 0.0  ;;  %v462_v12 = vmul.f32 %v3464_v8, %v3464_v8  ;;  %v404_v13 = vsel %vm394_vm0, %v3468_v10, 0.0  ;;  %v463_v14 = vmul.f32 %v3468_v10, %v3468_v10  ;;  %v3496_v24 = vld [vmem:[%s3446_s25 + $0x30] sm:$0xff]  ;;  %v3500_v26 = vld [vmem:[%s3446_s25 + $0x38] sm:$0xff]  ;;  %v3512_v32 = vld [vmem:[%s3446_s25 + $0x40] sm:$0xff]  ;;  %3010 = vmatpush3.bf16.msra.mxu0 %v3007_v46 }
  0x1e   : > { %v476_v6 = vsel %vm394_vm0, %v460_v4, 0.0  ;;  %v479_v9 = vsel %vm394_vm0, %v461_v5, 0.0  ;;  %v407_v19 = vsel %vm394_vm0, %v3480_v16, 0.0  ;;  %v464_v20 = vmul.f32 %v3480_v16, %v3480_v16  ;;  %v3516_v34 = vld [vmem:[%s3446_s25 + $0x48] sm:$0xff]  ;;  %v3540_v45 = vld [vmem:[%s3446_s25 + $0x50] sm:$0xff]  ;;  %v3544_v48 = vld [vmem:[%s3446_s25 + $0x58] sm:$0xff]  ;;  %3070 = vmatpush3.bf16.msra.mxu1 %v3007_v46 }
  0x1f   : > { %477 = vadd.xlane.f32.xlu1 %v476_v6  ;;  %v482_v15 = vsel %vm394_vm0, %v462_v12, 0.0  ;;  %v485_v17 = vsel %vm394_vm0, %v463_v14, 0.0  ;;  %v410_v21 = vsel %vm394_vm0, %v3484_v18, 0.0  ;;  %v465_v22 = vmul.f32 %v3484_v18, %v3484_v18  ;;  %v3556_v54 = vld [vmem:[%s3446_s25 + $0x60] sm:$0xff]  ;;  %v3560_v56 = vld [vmem:[%s3446_s25 + $0x68] sm:$0xff]  ;;  %v3572_v62 = vld [vmem:[%s3446_s25 + $0x70] sm:$0xff] }
  0x20   : > { %v488_v23 = vsel %vm394_vm0, %v464_v20, 0.0  ;;  %v413_v27 = vsel %vm394_vm0, %v3496_v24, 0.0  ;;  %v466_v28 = vmul.f32 %v3496_v24, %v3496_v24  ;;  %v416_v29 = vsel %vm394_vm0, %v3500_v26, 0.0  ;;  %v3576_v0 = vld [vmem:[%s3446_s25 + $0x78] sm:$0xff]  ;;  %s3592_s25 = scalar_lea.vmem %s4659_s1, %s3440_s22  ;;  %v1214_v12 = vld [vmem:[%s4665_s7 + $0x8] sm:$0xff]  ;;  %s2870_s22 = sshll.u32 %s3412_s13, 11 }
  0x21   : > { %399 = vadd.xlane.f32.xlu0 %v398_v7  ;;  %v491_v25 = vsel %vm394_vm0, %v465_v22, 0.0  ;;  %v467_v30 = vmul.f32 %v3500_v26, %v3500_v26  ;;  %v419_v37 = vsel %vm394_vm0, %v3512_v32, 0.0  ;;  %v468_v38 = vmul.f32 %v3512_v32, %v3512_v32  ;;  %v3616_v20 = vld [vmem:[%s3592_s25 + $0x18] sm:$0xff]  ;;  %v3624_v22 = vld [vmem:[%s3592_s25 + $0x20] sm:$0xff]  ;;  %v3665_v36 = vld [vmem:[%s3592_s25 + $0x70] sm:$0xff]  ;;  %s4610_s27 = scalar_lea.hbm %s4667_s9, %s2870_s22 }
  0x22   : > { %v494_v31 = vsel %vm394_vm0, %v466_v28, 0.0  ;;  %v422_v40 = vsel %vm394_vm0, %v3516_v34, 0.0  ;;  %v469_v41 = vmul.f32 %v3516_v34, %v3516_v34  ;;  %v425_v49 = vsel %vm394_vm0, %v3540_v45, 0.0  ;;  %v3640_v28 = vld [vmem:[%s3592_s25 + $0x30] sm:$0xff]  ;;  %v3660_v35 = vld [vmem:[%s3592_s25 + $0x60] sm:$0xff] }
  0x23   : > { %480 = vadd.xlane.f32.xlu1 %v479_v9  ;;  %v497_v33 = vsel %vm394_vm0, %v467_v30, 0.0  ;;  %v500_v42 = vsel %vm394_vm0, %v468_v38, 0.0  ;;  %v470_v50 = vmul.f32 %v3540_v45, %v3540_v45  ;;  %v428_v51 = vsel %vm394_vm0, %v3544_v48, 0.0 }
  0x24   : > { %v503_v47 = vsel %vm394_vm0, %v469_v41, 0.0  ;;  %v471_v52 = vmul.f32 %v3544_v48, %v3544_v48  ;;  %v431_v57 = vsel %vm394_vm0, %v3556_v54, 0.0  ;;  %v472_v58 = vmul.f32 %v3556_v54, %v3556_v54 }
  0x25   : > { %402 = vadd.xlane.f32.xlu0 %v401_v11  ;;  %v506_v53 = vsel %vm394_vm0, %v470_v50, 0.0  ;;  %v434_v59 = vsel %vm394_vm0, %v3560_v56, 0.0  ;;  %v473_v60 = vmul.f32 %v3560_v56, %v3560_v56  ;;  %v437_v3 = vsel %vm394_vm0, %v3572_v62, 0.0  ;;  %v3595_v11 = vld [vmem:[%s3592_s25 + $0x8] sm:$0xff] }
  0x26   : > { %v509_v55 = vsel %vm394_vm0, %v471_v52, 0.0  ;;  %v512_v61 = vsel %vm394_vm0, %v472_v58, 0.0  ;;  %v474_v4 = vmul.f32 %v3572_v62, %v3572_v62  ;;  %v440_v5 = vsel %vm394_vm0, %v3576_v0, 0.0 }
  0x27   : > { %405 = vadd.xlane.f32.xlu1 %v404_v13  ;;  %v515_v63 = vsel %vm394_vm0, %v473_v60, 0.0  ;;  %v475_v6 = vmul.f32 %v3576_v0, %v3576_v0  ;;  %v1216_v13 = vld [vmem:[%s4665_s7 + $0x18] sm:$0xff]  ;;  %v3334_v30 = vmov 2   ;;  %v3336_v38 = vmov 1  }
  0x28   : > { %v518_v7 = vsel %vm394_vm0, %v474_v4, 0.0  ;;  %v3023_v14 = vpack.c.bf16 %v1216_v13, %v1214_v12 }
  0x29   : > { %483 = vadd.xlane.f32.xlu0 %v482_v15  ;;  %v521_v9 = vsel %vm394_vm0, %v475_v6, 0.0  ;;  %v3604_v15 = vld [vmem:[%s3592_s25] sm:$0xff] }
  0x2a   : > { %3024 = vmatprep.subr.bf16.mxu0 %v3023_v14 }
  0x2b   : > { %486 = vadd.xlane.f32.xlu1 %v485_v17  ;;  %v3608_v17 = vld [vmem:[%s3592_s25 + $0x10] sm:$0xff] }
  0x2d   : > { %408 = vadd.xlane.f32.xlu0 %v407_v19  ;;  %v3613_v19 = vld [vmem:[%s3592_s25 + $0x48] sm:$0xff] }
  0x2f   : > { %411 = vadd.xlane.f32.xlu1 %v410_v21  ;;  %v3621_v21 = vld [vmem:[%s3592_s25 + $0x58] sm:$0xff] }
  0x31   : > { %489 = vadd.xlane.f32.xlu0 %v488_v23  ;;  %v3629_v23 = vld [vmem:[%s3592_s25 + $0x68] sm:$0xff] }
  0x33   : > { %492 = vadd.xlane.f32.xlu1 %v491_v25  ;;  %v3632_v25 = vld [vmem:[%s3592_s25 + $0x28] sm:$0xff] }
  0x35   : > { %414 = vadd.xlane.f32.xlu0 %v413_v27  ;;  %v3637_v27 = vld [vmem:[%s3592_s25 + $0x78] sm:$0xff] }
  0x37   : > { %417 = vadd.xlane.f32.xlu1 %v416_v29  ;;  %v3645_v29 = vld [vmem:[%s3592_s25 + $0x38] sm:$0xff] }
  0x39   : > { %495 = vadd.xlane.f32.xlu0 %v494_v31  ;;  %v3650_v31 = vld [vmem:[%s3592_s25 + $0x40] sm:$0xff] }
  0x3b   : > { %498 = vadd.xlane.f32.xlu1 %v497_v33  ;;  %v3655_v33 = vld [vmem:[%s3592_s25 + $0x50] sm:$0xff] }
  0x3d   : > { %420 = vadd.xlane.f32.xlu0 %v419_v37  ;;  %v3335_v37 = vmov 3  }
  0x3f   : > { %423 = vadd.xlane.f32.xlu1 %v422_v40 }
  0x41   : > { %501 = vadd.xlane.f32.xlu0 %v500_v42 }
  0x43   : > { %504 = vadd.xlane.f32.xlu1 %v503_v47 }
  0x45   : > { %426 = vadd.xlane.f32.xlu0 %v425_v49 }
  0x47   : > { %429 = vadd.xlane.f32.xlu1 %v428_v51 }
  0x49   : > { %507 = vadd.xlane.f32.xlu0 %v506_v53 }
  0x4b   : > { %510 = vadd.xlane.f32.xlu1 %v509_v55 }
  0x4d   : > { %432 = vadd.xlane.f32.xlu0 %v431_v57 }
  0x4f   : > { %435 = vadd.xlane.f32.xlu1 %v434_v59 }
  0x51   : > { %513 = vadd.xlane.f32.xlu0 %v512_v61 }
  0x53   : > { %516 = vadd.xlane.f32.xlu1 %v515_v63 }
  0x55   : > { %438 = vadd.xlane.f32.xlu0 %v437_v3 }
  0x57   : > { %441 = vadd.xlane.f32.xlu1 %v440_v5 }
  0x59   : > { %519 = vadd.xlane.f32.xlu0 %v518_v7 }
  0x5b   : > { %522 = vadd.xlane.f32.xlu1 %v521_v9 }
  0x6c   : > { %1124 = vperm.xlu1 %3214, %v3595_v11  }
  0x6f   : > { %1119 = vperm.xlu0 %3213, %v3604_v15  }
  0x70   : > { %1129 = vperm.xlu1 %3214, %v3608_v17  }
  0x73   : > { %1164 = vperm.xlu0 %3213, %v3613_v19  }
  0x74   : > { %1134 = vperm.xlu1 %3214, %v3616_v20  }
  0x77   : > { %1174 = vperm.xlu0 %3213, %v3621_v21  }
  0x78   : > { %1139 = vperm.xlu1 %3214, %v3624_v22  }
  0x7b   : > { %1184 = vperm.xlu0 %3213, %v3629_v23  }
  0x7c   : > { %1144 = vperm.xlu1 %3214, %v3632_v25  }
  0x7f   : > { %1194 = vperm.xlu0 %3213, %v3637_v27  }
  0x80   : > { %1149 = vperm.xlu1 %3214, %v3640_v28  }
  0x83   : > { %3216 = vset.pattern.permute.xlu0 %v3334_v30 }
  0x84   : > { %1154 = vperm.xlu1 %3214, %v3645_v29   ;;  %1743 = vperm.xlu0 %3216, %v3595_v11  }
  0x88   : > { %1159 = vperm.xlu1 %3214, %v3650_v31   ;;  %1755 = vperm.xlu0 %3216, %v3624_v22  }
  0x8c   : > { %1169 = vperm.xlu1 %3214, %v3655_v33   ;;  %1763 = vperm.xlu0 %3216, %v3640_v28  }
  0x90   : > { %1179 = vperm.xlu1 %3214, %v3660_v35   ;;  %1771 = vperm.xlu0 %3216, %v3650_v31  }
  0x94   : > { %1189 = vperm.xlu1 %3214, %v3665_v36   ;;  %1779 = vperm.xlu0 %3216, %v3655_v33  }
  0x98   : > { %3215 = vset.pattern.permute.xlu1 %v3334_v30  ;;  %1787 = vperm.xlu0 %3216, %v3660_v35  }
  0x99   : > { %1739 = vperm.xlu1 %3215, %v3604_v15  }
  0x9c   : > { %1795 = vperm.xlu0 %3216, %v3665_v36  }
  0x9d   : > { %1747 = vperm.xlu1 %3215, %v3608_v17  }
  0xa0   : > { %3219 = vset.pattern.permute.xlu0 %v3335_v37 }
  0xa1   : > { %1751 = vperm.xlu1 %3215, %v3616_v20   ;;  %2077 = vperm.xlu0 %3219, %v3595_v11  }
  0xa5   : > { %1759 = vperm.xlu1 %3215, %v3632_v25   ;;  %3220 = vset.pattern.permute.xlu0 %v3336_v38 }
  0xa6   : > { %1220 = vperm.xlu0 %3220, %v3604_v15  }
  0xa9   : > { %1767 = vperm.xlu1 %3215, %v3645_v29  }
  0xaa   : > { %v397_v39 = vpop.xlane.xlu0 %396  ;;  %1232 = vperm.xlu0 %3220, %v3616_v20  }
  0xab   : > { %v444_v40 = vmul.f32 0.03125, %v397_v39 }
  0xac   : > { %v478_v41 = vpop.xlane.xlu1 %477 }
  0xad   : > { %v540_v42 = vmul.f32 %v444_v40, %v444_v40  ;;  %v524_v43 = vmul.f32 0.03125, %v478_v41  ;;  %1775 = vperm.xlu1 %3215, %v3613_v19   ;;  %v572_v30 = vsub.f32 %v3449_v1, %v444_v40  ;;  %v1213_v1 = vld [vmem:[%s4665_s7] sm:$0xff]  ;;  %v1215_v40 = vld [vmem:[%s4665_s7 + $0x10] sm:$0xff] }
  0xae   : > { %v400_v44 = vpop.xlane.xlu0 %399  ;;  %3223 = vset.pattern.permute.xlu0 %v3335_v37 }
  0xaf   : > { %v556_v46 = vsub.f32 %v524_v43, %v540_v42  ;;  %v445_v47 = vmul.f32 0.03125, %v400_v44  ;;  %2089 = vperm.xlu0 %3223, %v3624_v22  }
  0xb0   : > { %v481_v49 = vpop.xlane.xlu1 %480 }
  0xb1   : > { %v588_v50 = vadd.f32 1e-05, %v556_v46  ;;  %v541_v51 = vmul.f32 %v445_v47, %v445_v47  ;;  %v525_v52 = vmul.f32 0.03125, %v481_v49  ;;  %1783 = vperm.xlu1 %3215, %v3621_v21  }
  0xb2   : > { %v403_v53 = vpop.xlane.xlu0 %402 }
  0xb3   : > { %3237 = vrsqrt.f32 %v588_v50  ;;  %v557_v55 = vsub.f32 %v525_v52, %v541_v51  ;;  %v3685_v57 = vmul.f32 0.03125, %v403_v53  ;;  %2101 = vperm.xlu0 %3223, %v3645_v29   ;;  %v573_v51 = vsub.f32 %v3452_v2, %v445_v47 }
  0xb4   : > { %v406_v58 = vpop.xlane.xlu1 %405 }
  0xb5   : > { %v589_v59 = vadd.f32 1e-05, %v557_v55  ;;  %v542_v60 = vmul.f32 %v3685_v57, %v3685_v57  ;;  %v3690_v61 = vmul.f32 0.03125, %v406_v58  ;;  %1791 = vperm.xlu1 %3215, %v3629_v23  }
  0xb6   : > { %v484_v63 = vpop.xlane.xlu0 %483 }
  0xb7   : > { %3239 = vrsqrt.f32 %v589_v59  ;;  %v526_v3 = vmul.f32 0.03125, %v484_v63  ;;  %3226 = vset.pattern.permute.xlu0 %v3336_v38  ;;  %v543_v5 = vmul.f32 %v3690_v61, %v3690_v61  ;;  %v3025_v59 = vpack.c.bf16 %v1215_v40, %v1213_v1 }
  0xb8   : > { %v487_v4 = vpop.xlane.xlu1 %486  ;;  %1244 = vperm.xlu0 %3226, %v3640_v28  }
  0xb9   : > { %v558_v6 = vsub.f32 %v526_v3, %v542_v60  ;;  %v527_v7 = vmul.f32 0.03125, %v487_v4  ;;  %1799 = vperm.xlu1 %3215, %v3637_v27   ;;  %v1218_v4 = vld [vmem:[%s4665_s7 + $0x28] sm:$0xf] }
  0xba   : > { %v409_v9 = vpop.xlane.xlu0 %408 }
  0xbb   : > { %v590_v12 = vadd.f32 1e-05, %v558_v6  ;;  %v559_v13 = vsub.f32 %v527_v7, %v543_v5  ;;  %v3698_v14 = vmul.f32 0.03125, %v409_v9  ;;  %v574_v9 = vsub.f32 %v3464_v8, %v3685_v57 }
  0xbc   : > { %v412_v39 = vpop.xlane.xlu1 %411  ;;  %1256 = vperm.xlu0 %3226, %v3613_v19  }
  0xbd   : > { %v3238_v41 = vpop.eup %3237  ;;  %3241 = vrsqrt.f32 %v590_v12  ;;  %v591_v42 = vadd.f32 1e-05, %v559_v13  ;;  %v544_v43 = vmul.f32 %v3698_v14, %v3698_v14  ;;  %3217 = vset.pattern.permute.xlu1 %v3335_v37  ;;  %v3705_v44 = vmul.f32 0.03125, %v412_v39  ;;  %v1217_v13 = vld [vmem:[%s4665_s7 + $0x20] sm:$0xf]  ;;  %v2820_v39 = vld [vmem:[%s4665_s7 + $0x78] sm:$0xff] }
  0xbe   : > { %v490_v46 = vpop.xlane.xlu0 %489  ;;  %v620_v49 = vmul.f32 %v3238_v41, %v572_v30  ;;  %2073 = vperm.xlu1 %3217, %v3604_v15   ;;  %v2818_v30 = vld [vmem:[%s4665_s7 + $0x68] sm:$0xff]  ;;  %v575_v41 = vsub.f32 %v3468_v10, %v3690_v61 }
  0xbf   : > { %3243 = vrsqrt.f32 %v591_v42  ;;  %v528_v50 = vmul.f32 0.03125, %v490_v46  ;;  %v545_v15 = vmul.f32 %v3705_v44, %v3705_v44 }
  0xc0   : > { %v493_v52 = vpop.xlane.xlu1 %492  ;;  %2979 = vmatprep.mubr.msk.f32.mxu0 %vm394_vm0, %v620_v49  ;;  %3229 = vset.pattern.permute.xlu0 %v3335_v37 }
  0xc1   : > { %v3240_v53 = vpop.eup %3239  ;;  %v560_v55 = vsub.f32 %v528_v50, %v544_v43  ;;  %v529_v58 = vmul.f32 0.03125, %v493_v52  ;;  %2113 = vperm.xlu0 %3229, %v3655_v33   ;;  %v3027_v50 = vpack.c.bf16 %v2820_v39, %v2818_v30 }
  0xc2   : > { %v415_v60 = vpop.xlane.xlu0 %414  ;;  %v621_v63 = vmul.f32 %v3240_v53, %v573_v51  ;;  %3218 = vset.pattern.permute.xlu1 %v3336_v38 }
  0xc3   : > { %v592_v3 = vadd.f32 1e-05, %v560_v55  ;;  %v561_v2 = vsub.f32 %v529_v58, %v545_v15  ;;  %v3721_v47 = vmul.f32 0.03125, %v415_v60  ;;  %1224 = vperm.xlu1 %3218, %v3595_v11  }
  0xc4   : > { %v418_v5 = vpop.xlane.xlu1 %417  ;;  %2980 = vmatmul.mubr.msk.f32.vlgmr.msra.gmra.mrb[0].mxu0 %vm394_vm0, %v621_v63 }
  0xc5   : > { %3245 = vrsqrt.f32 %v592_v3  ;;  %v593_v6 = vadd.f32 1e-05, %v561_v2  ;;  %v546_v7 = vmul.f32 %v3721_v47, %v3721_v47  ;;  %3026 = vmatpush1.bf16.msra.mxu0 %v3025_v59  ;;  %3231 = vset.pattern.permute.xlu0 %v3336_v38  ;;  %v3733_v11 = vmul.f32 0.03125, %v418_v5 }
  0xc6   : > { %v496_v12 = vpop.xlane.xlu0 %495  ;;  %2799 = vmatprep.subr.msk.mxu0 %vm1355_vm1, %v1218_v4  ;;  %1268 = vperm.xlu0 %3231, %v3660_v35   ;;  %v576_v59 = vsub.f32 %v3480_v16, %v3698_v14 }
  0xc7   : > { %v3242_v8 = vpop.eup %3241  ;;  %3247 = vrsqrt.f32 %v593_v6  ;;  %v530_v57 = vmul.f32 0.03125, %v496_v12  ;;  %1228 = vperm.xlu1 %3218, %v3608_v17   ;;  %v547_v49 = vmul.f32 %v3733_v11, %v3733_v11 }
  0xc8   : > { %v499_v42 = vpop.xlane.xlu1 %498  ;;  %v622_v43 = vmul.f32 %v3242_v8, %v574_v9  ;;  %v578_v8 = vsub.f32 %v3496_v24, %v3721_v47 }
  0xc9   : > { %v3244_v46 = vpop.eup %3243  ;;  %v562_v1 = vsub.f32 %v530_v57, %v546_v7  ;;  %v531_v40 = vmul.f32 0.03125, %v499_v42  ;;  %2800 = vmatpush1.msk.msra.mxu0 %vm1355_vm1, %v1217_v13 }
  0xca   : > { %2982 = vmatprep.mubr.msk.f32.mxu0 %vm394_vm0, %v622_v43  ;;  %v421_v51 = vpop.xlane.xlu0 %420  ;;  %v623_v52 = vmul.f32 %v3244_v46, %v575_v41  ;;  %3233 = vset.pattern.permute.xlu0 %v3335_v37  ;;  %v579_v46 = vsub.f32 %v3500_v26, %v3733_v11 }
  0xcb   : > { %v594_v53 = vadd.f32 1e-05, %v562_v1  ;;  %v563_v15 = vsub.f32 %v531_v40, %v547_v49  ;;  %v3754_v10 = vmul.f32 0.03125, %v421_v51  ;;  %3221 = vset.pattern.permute.xlu1 %v3335_v37  ;;  %2125 = vperm.xlu0 %3233, %v3629_v23  }
  0xcc   : > { %v424_v61 = vpop.xlane.xlu1 %423  ;;  %2983 = vmatmul.mubr.msk.f32.gmra.mrb[2].mxu0 %vm394_vm0, %v623_v52  ;;  %2081 = vperm.xlu1 %3221, %v3608_v17   ;;  %v577_v17 = vsub.f32 %v3484_v18, %v3705_v44 }
  0xcd   : > { %3249 = vrsqrt.f32 %v594_v53  ;;  %v595_v55 = vadd.f32 1e-05, %v563_v15  ;;  %v548_v58 = vmul.f32 %v3754_v10, %v3754_v10  ;;  %3028 = vmatprep.subr.bf16.mxu0 %v3027_v50  ;;  %v3764_v60 = vmul.f32 0.03125, %v424_v61 }
  0xce   : > { %v502_v63 = vpop.xlane.xlu0 %501 }
  0xcf   : > { %v3246_v3 = vpop.eup %3245  ;;  %3251 = vrsqrt.f32 %v595_v55  ;;  %v532_v2 = vmul.f32 0.03125, %v502_v63  ;;  %3235 = vset.pattern.permute.xlu0 %v3336_v38  ;;  %v549_v16 = vmul.f32 %v3764_v60, %v3764_v60  ;;  %v3337_v55 = vmov 0.0  }
  0xd0   : > { %v505_v4 = vpop.xlane.xlu1 %504  ;;  %v624_v5 = vmul.f32 %v3246_v3, %v576_v59  ;;  %2085 = vperm.xlu1 %3221, %v3616_v20   ;;  %1280 = vperm.xlu0 %3235, %v3637_v27  }
  0xd1   : > { %v3248_v6 = vpop.eup %3247  ;;  %v564_v14 = vsub.f32 %v532_v2, %v548_v58  ;;  %v533_v7 = vmul.f32 0.03125, %v505_v4  ;;  %v580_v58 = vsub.f32 %v3512_v32, %v3754_v10 }
  0xd2   : > { %2985 = vmatprep.mubr.msk.f32.mxu0 %vm394_vm0, %v624_v5  ;;  %v427_v9 = vpop.xlane.xlu0 %426  ;;  %v625_v12 = vmul.f32 %v3248_v6, %v577_v17  ;;  %v581_v17 = vsub.f32 %v3516_v34, %v3764_v60 }
  0xd3   : > { %v596_v13 = vadd.f32 1e-05, %v564_v14  ;;  %v565_v30 = vsub.f32 %v533_v7, %v549_v16  ;;  %v3774_v39 = vmul.f32 0.03125, %v427_v9 }
  0xd4   : > { %v430_v18 = vpop.xlane.xlu1 %429  ;;  %2986 = vmatmul.mubr.msk.f32.gmra.mrb[4].mxu0 %vm394_vm0, %v625_v12  ;;  %3222 = vset.pattern.permute.xlu1 %v3336_v38 }
  0xd5   : > { %3253 = vrsqrt.f32 %v596_v13  ;;  %v597_v20 = vadd.f32 1e-05, %v565_v30  ;;  %v550_v44 = vmul.f32 %v3774_v39, %v3774_v39  ;;  %1236 = vperm.xlu1 %3222, %v3624_v22   ;;  %3236 = vset.pattern.permute.xlu0 %v3335_v37  ;;  %v3784_v57 = vmul.f32 0.03125, %v430_v18 }
  0xd6   : > { %v508_v41 = vpop.xlane.xlu0 %507  ;;  %v582_v30 = vsub.f32 %v3540_v45, %v3774_v39 }
  0xd7   : > { %v3250_v42 = vpop.eup %3249  ;;  %3255 = vrsqrt.f32 %v597_v20  ;;  %v534_v43 = vmul.f32 0.03125, %v508_v41  ;;  %v551_v22 = vmul.f32 %v3784_v57, %v3784_v57 }
  0xd8   : > { %v511_v49 = vpop.xlane.xlu1 %510  ;;  %v626_v1 = vmul.f32 %v3250_v42, %v578_v8  ;;  %v583_v8 = vsub.f32 %v3544_v48, %v3784_v57  ;;  %v3835_v57 = vld [vmem:[%s3829_s21] sm:$0xff] }
  0xd9   : > { %v3252_v40 = vpop.eup %3251  ;;  %v566_v50 = vsub.f32 %v534_v43, %v550_v44  ;;  %v535_v51 = vmul.f32 0.03125, %v511_v49  ;;  %1240 = vperm.xlu1 %3222, %v3632_v25  }
  0xda   : > { %2988 = vmatprep.mubr.msk.f32.mxu0 %vm394_vm0, %v626_v1  ;;  %v433_v24 = vpop.xlane.xlu0 %432  ;;  %v627_v47 = vmul.f32 %v3252_v40, %v579_v46  ;;  %v2817_v40 = vld [vmem:[%s4665_s7 + $0x60] sm:$0xff] }
  0xdb   : > { %v598_v52 = vadd.f32 1e-05, %v566_v50  ;;  %v567_v53 = vsub.f32 %v535_v51, %v551_v22  ;;  %v3792_v15 = vmul.f32 0.03125, %v433_v24  ;;  %v2819_v22 = vld [vmem:[%s4665_s7 + $0x70] sm:$0xff] }
  0xdc   : > { %v436_v61 = vpop.xlane.xlu1 %435  ;;  %2989 = vmatmul.mubr.msk.f32.gmra.mrb[6].mxu0 %vm394_vm0, %v627_v47  ;;  %v3846_v47 = vld [vmem:[%s3829_s21 + $0x8] sm:$0xff] }
  0xdd   : > { %3257 = vrsqrt.f32 %v598_v52  ;;  %v599_v26 = vadd.f32 1e-05, %v567_v53  ;;  %v552_v11 = vmul.f32 %v3792_v15, %v3792_v15  ;;  %1641 = vmatprep.mubr.f32.mxu0 %v3337_v55  ;;  %3224 = vset.pattern.permute.xlu1 %v3335_v37  ;;  %v3801_v59 = vmul.f32 0.03125, %v436_v61 }
  0xde   : > { %v514_v63 = vpop.xlane.xlu0 %513  ;;  %2093 = vperm.xlu1 %3224, %v3632_v25   ;;  %v584_v51 = vsub.f32 %v3556_v54, %v3792_v15  ;;  %v3029_v61 = vpack.c.bf16 %v2819_v22, %v2817_v40  ;;  %v3956_v40 = vld [vmem:[%s3829_s21 + $0x50] sm:$0xff] }
  0xdf   : > { %v3254_v3 = vpop.eup %3253  ;;  %3259 = vrsqrt.f32 %v599_v26  ;;  %v536_v2 = vmul.f32 0.03125, %v514_v63  ;;  %v553_v16 = vmul.f32 %v3801_v59, %v3801_v59  ;;  %v585_v26 = vsub.f32 %v3560_v56, %v3801_v59  ;;  %v2842_v63 = vld [vmem:[%s4665_s7 + $0x98] sm:$0xff]  ;;  %v2822_v59 = vld [vmem:[%s4665_s7 + $0x88] sm:$0xf] }
  0xe0   : > { %v517_v4 = vpop.xlane.xlu1 %516  ;;  %v628_v5 = vmul.f32 %v3254_v3, %v580_v58  ;;  %v2844_v3 = vld [vmem:[%s4665_s7 + $0xa8] sm:$0xff] }
  0xe1   : > { %v3256_v6 = vpop.eup %3255  ;;  %v568_v14 = vsub.f32 %v536_v2, %v552_v11  ;;  %v537_v7 = vmul.f32 0.03125, %v517_v4  ;;  %v3031_v4 = vpack.c.bf16 %v2844_v3, %v2842_v63 }
  0xe2   : > { %2991 = vmatprep.mubr.msk.f32.mxu1 %vm394_vm0, %v628_v5  ;;  %v439_v32 = vpop.xlane.xlu0 %438  ;;  %v629_v10 = vmul.f32 %v3256_v6, %v581_v17  ;;  %2097 = vperm.xlu1 %3224, %v3640_v28   ;;  %v2821_v17 = vld [vmem:[%s4665_s7 + $0x80] sm:$0xf] }
  0xe3   : > { %v600_v25 = vadd.f32 1e-05, %v568_v14  ;;  %v569_v9 = vsub.f32 %v537_v7, %v553_v16  ;;  %v3810_v12 = vmul.f32 0.03125, %v439_v32  ;;  %v3881_v16 = vld [vmem:[%s3829_s21 + $0x18] sm:$0xff] }
  0xe4   : > { %v442_v13 = vpop.xlane.xlu1 %441  ;;  %2992 = vmatmul.mubr.msk.f32.vlgmr.msra.gmra.mrb[0].mxu1 %vm394_vm0, %v629_v10 }
  0xe5   : > { %3261 = vrsqrt.f32 %v600_v25  ;;  %v601_v34 = vadd.f32 1e-05, %v569_v9  ;;  %v554_v60 = vmul.f32 %v3810_v12, %v3810_v12  ;;  %v3817_v18 = vmul.f32 0.03125, %v442_v13 }
  0xe6   : > { %v520_v20 = vpop.xlane.xlu0 %519  ;;  %3225 = vset.pattern.permute.xlu1 %v3336_v38  ;;  %v586_v6 = vsub.f32 %v3572_v62, %v3810_v12 }
  0xe7   : > { %v3258_v28 = vpop.eup %3257  ;;  %3263 = vrsqrt.f32 %v601_v34  ;;  %v538_v44 = vmul.f32 0.03125, %v520_v20  ;;  %1248 = vperm.xlu1 %3225, %v3645_v29   ;;  %v555_v46 = vmul.f32 %v3817_v18, %v3817_v18  ;;  %v587_v14 = vsub.f32 %v3576_v0, %v3817_v18  ;;  %v3893_v0 = vld [vmem:[%s3829_s21 + $0x20] sm:$0xff]  ;;  %v3916_v20 = vld [vmem:[%s3829_s21 + $0x38] sm:$0xff] }
  0xe8   : > { %v523_v41 = vpop.xlane.xlu1 %522  ;;  %v630_v42 = vmul.f32 %v3258_v28, %v582_v30 }
  0xe9   : > { %v3260_v43 = vpop.eup %3259  ;;  %v570_v45 = vsub.f32 %v538_v44, %v554_v60  ;;  %v539_v39 = vmul.f32 0.03125, %v523_v41  ;;  %v3909_v60 = vld [vmem:[%s3829_s21 + $0x30] sm:$0xff]  ;;  %v3929_v41 = vld [vmem:[%s3829_s21 + $0x40] sm:$0xff] }
  0xea   : > { %2994 = vmatprep.mubr.msk.f32.mxu1 %vm394_vm0, %v630_v42  ;;  %v631_v29 = vmul.f32 %v3260_v43, %v583_v8  ;;  %v859_v8 = vld [vmem:[%s4663_s5 + $0x18] sm:$0xff]  ;;  %v856_v42 = vld [vmem:[%s4663_s5] sm:$0xff]  ;;  %v858_v43 = vld [vmem:[%s4663_s5 + $0x10] sm:$0xff] }
  0xeb   : > { %v602_v49 = vadd.f32 1e-05, %v570_v45  ;;  %v571_v48 = vsub.f32 %v539_v39, %v555_v46  ;;  %1252 = vperm.xlu1 %3225, %v3650_v31   ;;  %v3013_v46 = vpack.c.bf16 %v858_v43, %v856_v42 }
  0xec   : > { %2995 = vmatmul.mubr.msk.f32.gmra.mrb[2].mxu1 %vm394_vm0, %v631_v29  ;;  %v1125_v1 = vpop.permute.xlu1 %1124  ;;  %v3943_v29 = vld [vmem:[%s3829_s21 + $0x48] sm:$0xff] }
  0xed   : > { %3265 = vrsqrt.f32 %v602_v49  ;;  %v603_v50 = vadd.f32 1e-05, %v571_v48  ;;  %v1198_v15 = vmul.f32 %v1125_v1, %v3846_v47  ;;  %v861_v48 = vld [vmem:[%s4663_s5 + $0x28] sm:$0xff]  ;;  %v863_v1 = vld [vmem:[%s4663_s5 + $0x38] sm:$0xff] }
  0xee   : > { %v1120_v24 = vpop.permute.xlu0 %1119  ;;  %v3015_v22 = vpack.c.bf16 %v863_v1, %v861_v48 }
  0xef   : > { %v3262_v52 = vpop.eup %3261  ;;  %3267 = vrsqrt.f32 %v603_v50  ;;  %v1197_v53 = vmul.f32 %v1120_v24, %v3835_v57  ;;  %3227 = vset.pattern.permute.xlu1 %v3335_v37  ;;  %v860_v50 = vld [vmem:[%s4663_s5 + $0x20] sm:$0xff] }
  0xf0   : > { %v632_v11 = vmul.f32 %v3262_v52, %v584_v51  ;;  %v1130_v58 = vpop.permute.xlu1 %1129  ;;  %2105 = vperm.xlu1 %3227, %v3650_v31   ;;  %v3864_v31 = vld [vmem:[%s3829_s21 + $0x10] sm:$0xff] }
  0xf1   : > { %v3264_v54 = vpop.eup %3263  ;;  %2801 = vmatmul.mubr.msk.f32.vlgmr.msra.gmra.mrb[8].mxu0 %vm1306_vm2, %v1197_v53  ;;  %v1199_v5 = vmul.f32 %v1130_v58, %v3864_v31  ;;  %v862_v51 = vld [vmem:[%s4663_s5 + $0x30] sm:$0xff]  ;;  %v2776_v58 = vld [vmem:[%s4665_s7 + $0x38] sm:$0xff] }
  0xf2   : > { %2997 = vmatprep.mubr.msk.f32.mxu1 %vm394_vm0, %v632_v11  ;;  %v633_v56 = vmul.f32 %v3264_v54, %v585_v26  ;;  %1647 = vmatprep.mubr.f32.mxu0 %v3337_v55  ;;  %v3017_v24 = vpack.c.bf16 %v862_v51, %v860_v50  ;;  %v3970_v26 = vld [vmem:[%s3829_s21 + $0x58] sm:$0xff]  ;;  %v2778_v54 = vld [vmem:[%s4665_s7 + $0x48] sm:$0xff] }
  0xf3   : > { %3030 = vmatpush1.bf16.msra.mxu0 %v3029_v61 }
  0xf4   : > { %2998 = vmatmul.mubr.msk.f32.gmra.mrb[4].mxu1 %vm394_vm0, %v633_v56  ;;  %v1135_v2 = vpop.permute.xlu1 %1134  ;;  %2109 = vperm.xlu1 %3227, %v3613_v19   ;;  %v3989_v56 = vld [vmem:[%s3829_s21 + $0x68] sm:$0xff] }
  0xf5   : > { %2802 = vmatmul.mubr.msk.f32.gmra.mrb[10].mxu0 %vm1306_vm2, %v1198_v15  ;;  %2823 = vmatprep.subr.msk.mxu0 %vm1355_vm1, %v2822_v59  ;;  %v1200_v62 = vmul.f32 %v1135_v2, %v3881_v16 }
  0xf6   : > { %1653 = vmatprep.mubr.f32.mxu0 %v3337_v55 }
  0xf7   : > { %v3266_v19 = vpop.eup %3265  ;;  %2824 = vmatpush1.msk.msra.mxu0 %vm1355_vm1, %v2821_v17  ;;  %v3995_v17 = vld [vmem:[%s3829_s21 + $0x70] sm:$0xff] }
  0xf8   : > { %v634_v7 = vmul.f32 %v3266_v19, %v586_v6  ;;  %v1140_v32 = vpop.permute.xlu1 %1139  ;;  %3228 = vset.pattern.permute.xlu1 %v3336_v38  ;;  %3032 = vmatprep.subr.bf16.mxu0 %v3031_v4  ;;  %v4001_v19 = vld [vmem:[%s3829_s21 + $0x78] sm:$0xff] }
  0xf9   : > { %v3268_v10 = vpop.eup %3267  ;;  %2803 = vmatmul.mubr.msk.f32.gmra.mrb[12].mxu0 %vm1306_vm2, %v1199_v5  ;;  %1260 = vperm.xlu1 %3228, %v3655_v33   ;;  %v1201_v12 = vmul.f32 %v1140_v32, %v3893_v0  ;;  %v3901_v33 = vld [vmem:[%s3829_s21 + $0x28] sm:$0xff]  ;;  %v2841_v32 = vld [vmem:[%s4665_s7 + $0x90] sm:$0xff] }
  0xfa   : > { %3000 = vmatprep.mubr.msk.f32.mxu1 %vm394_vm0, %v634_v7  ;;  %v635_v25 = vmul.f32 %v3268_v10, %v587_v14  ;;  %1659 = vmatprep.mubr.f32.mxu0 %v3337_v55  ;;  %v2843_v10 = vld [vmem:[%s4665_s7 + $0xa0] sm:$0xff] }
  0xfc   : > { %3001 = vmatmul.mubr.msk.f32.gmra.mrb[6].mxu1 %vm394_vm0, %v635_v25  ;;  %v1145_v9 = vpop.permute.xlu1 %1144 }
  0xfd   : > { %2804 = vmatmul.mubr.msk.f32.gmra.mrb[14].mxu0 %vm1306_vm2, %v1200_v62  ;;  %1264 = vperm.xlu1 %3228, %v3621_v21   ;;  %v1202_v34 = vmul.f32 %v1145_v9, %v3901_v33 }
  0xfe   : > { %1665 = vmatprep.mubr.f32.mxu0 %v3337_v55  ;;  %988 = vmatprep.mubr.f32.mxu1 %v3337_v55 }
 0x100   : > { %v1150_v13 = vpop.permute.xlu1 %1149 }
 0x101   : > { %2805 = vmatmul.mubr.msk.f32.gmra.mrb[16].mxu0 %vm1306_vm2, %v1201_v12  ;;  %3230 = vset.pattern.permute.xlu1 %v3335_v37  ;;  %v1203_v18 = vmul.f32 %v1150_v13, %v3909_v60  ;;  %v3033_v12 = vpack.c.bf16 %v2843_v10, %v2841_v32 }
 0x102   : > { %1671 = vmatprep.mubr.f32.mxu0 %v3337_v55  ;;  %2117 = vperm.xlu1 %3230, %v3621_v21   ;;  %v857_v21 = vld [vmem:[%s4663_s5 + $0x8] sm:$0xff] }
 0x104   : > { %v1155_v30 = vpop.permute.xlu1 %1154 }
 0x105   : > { %2806 = vmatmul.mubr.msk.f32.gmra.mrb[18].mxu0 %vm1306_vm2, %v1202_v34  ;;  %v1204_v44 = vmul.f32 %v1155_v30, %v3916_v20  ;;  %v2846_v34 = vld [vmem:[%s4665_s7 + $0xb8] sm:$0xf] }
 0x106   : > { %1677 = vmatprep.mubr.f32.mxu0 %v3337_v55  ;;  %2121 = vperm.xlu1 %3230, %v3660_v35   ;;  %v3011_v35 = vpack.c.bf16 %v859_v8, %v857_v21 }
 0x108   : > { %v1160_v28 = vpop.permute.xlu1 %1159  ;;  %3012 = vmatprep.subr.bf16.mxu1 %v3011_v35 }
 0x109   : > { %2807 = vmatmul.mubr.msk.f32.gmra.mrb[20].mxu0 %vm1306_vm2, %v1203_v18  ;;  %v1205_v39 = vmul.f32 %v1160_v28, %v3929_v41  ;;  %3014 = vmatpush1.bf16.msra.mxu1 %v3013_v46  ;;  %v2845_v18 = vld [vmem:[%s4665_s7 + $0xb0] sm:$0xf] }
 0x10a   : > { %1683 = vmatprep.mubr.f32.mxu0 %v3337_v55  ;;  %3232 = vset.pattern.permute.xlu1 %v3336_v38  ;;  %v1165_v38 = vpop.permute.xlu0 %1164 }
 0x10b   : > { %1272 = vperm.xlu1 %3232, %v3629_v23   ;;  %v1206_v23 = vmul.f32 %v1165_v38, %v3943_v29  ;;  %3016 = vmatprep.subr.bf16.mxu1 %v3015_v22 }
 0x10c   : > { %v1170_v45 = vpop.permute.xlu1 %1169 }
 0x10d   : > { %2808 = vmatmul.mubr.msk.f32.gmra.mrb[22].mxu0 %vm1306_vm2, %v1204_v44  ;;  %v1207_v53 = vmul.f32 %v1170_v45, %v3956_v40  ;;  %3018 = vmatpush1.bf16.msra.mxu1 %v3017_v24 }
 0x10e   : > { %1689 = vmatprep.mubr.f32.mxu0 %v3337_v55  ;;  %v1175_v61 = vpop.permute.xlu0 %1174 }
 0x10f   : > { %1276 = vperm.xlu1 %3232, %v3665_v36   ;;  %v1208_v11 = vmul.f32 %v1175_v61, %v3970_v26 }
 0x110   : > { %v1180_v49 = vpop.permute.xlu1 %1179 }
 0x111   : > { %2809 = vmatmul.mubr.msk.f32.gmra.mrb[24].mxu0 %vm1306_vm2, %v1205_v39 }
 0x112   : > { %1695 = vmatprep.mubr.f32.mxu0 %v3337_v55  ;;  %v1185_v3 = vpop.permute.xlu0 %1184 }
 0x113   : > { %3234 = vset.pattern.permute.xlu1 %v3335_v37  ;;  %v1210_v2 = vmul.f32 %v1185_v3, %v3989_v56 }
 0x114   : > { %v1190_v52 = vpop.permute.xlu1 %1189  ;;  %2129 = vperm.xlu1 %3234, %v3665_v36   ;;  %v3977_v36 = vld [vmem:[%s3829_s21 + $0x60] sm:$0xff]  ;;  %s2645_s21 = sshll.u32 %s4588_s24, 4  ;;  %s4612_s21 = int_to_ptr.vmem [resolvable:$true] %s2645_s21 }
 0x115   : > { %2810 = vmatmul.mubr.msk.f32.gmra.mrb[26].mxu0 %vm1306_vm2, %v1206_v23  ;;  %v1209_v63 = vmul.f32 %v1180_v49, %v3977_v36  ;;  %v1211_v5 = vmul.f32 %v1190_v52, %v3995_v17  ;;  %s3269_s13 = scalar_lea.vmem %s4612_s21, 2048  ;;  %p3276_p0 = scmp.lt.s32.totalorder %s4612_s21, %s3274_s14 }
 0x116   : > { %1701 = vmatprep.mubr.f32.mxu0 %v3337_v55  ;;  %v1195_v6 = vpop.permute.xlu0 %1194  ;;  %p3270_p11 = scmp.ne.s32.totalorder %s4612_s21, %s3269_s13  ;;  %p3277_p1 = scmp.lt.s32.totalorder %s3275_s16, %s3269_s13 }
 0x117   : > { %v1212_v7 = vmul.f32 %v1195_v6, %v4001_v19 }
 0x118   : > { %2133 = vperm.xlu1 %3234, %v3637_v27   ;;  %v1740_v37 = vpop.permute.xlu1 %1739  ;;  %v3019_v27 = vpack.c.bf16 %v2778_v54, %v2776_v58  ;;  %p3271_p12 = pnand %p3270_p11, %p3429_p5  ;;  %p3278_p2 = por %p3277_p1, %p3276_p0 }
 0x119   : > { %2811 = vmatmul.mubr.msk.f32.gmra.mrb[28].mxu0 %vm1306_vm2, %v1207_v53  ;;  %v1802_v25 = vmul.f32 %v1740_v37, %v3835_v57 }
 0x11a   : > { %1707 = vmatprep.mubr.f32.mxu0 %v3337_v55  ;;  %3020 = vmatprep.subr.bf16.mxu1 %v3019_v27  ;;  %v1744_v9 = vpop.permute.xlu0 %1743  ;;  %p3272_p13 = pneg %p3271_p12 }
 0x11b   : > { %v1803_v30 = vmul.f32 %v1744_v9, %v3846_v47 }
 0x11c   : > { %v1748_v15 = vpop.permute.xlu1 %1747  ;;  %p3279_p3 = pnand %p3278_p2, %p3272_p13 }
 0x11d   : > { %2812 = vmatmul.mubr.msk.f32.gmra.mrb[30].mxu0 %vm1306_vm2, %v1208_v11  ;;  %v1804_v44 = vmul.f32 %v1748_v15, %v3864_v31 }
 0x11e   : > { %1713 = vmatprep.mubr.f32.mxu0 %v3337_v55  ;;  %v1756_v35 = vpop.permute.xlu0 %1755 }
 0x11f   : > { %v1806_v42 = vmul.f32 %v1756_v35, %v3893_v0 }
 0x120   : > { %v1752_v59 = vpop.permute.xlu1 %1751 }
 0x121   : > { %2813 = vmatmul.mubr.msk.f32.gmra.mrb[32].mxu0 %vm1306_vm2, %v1209_v63  ;;  %v1805_v8 = vmul.f32 %v1752_v59, %v3881_v16 }
 0x122   : > { %1719 = vmatprep.mubr.f32.mxu0 %v3337_v55  ;;  %v1764_v45 = vpop.permute.xlu0 %1763 }
 0x123   : > { %v1808_v38 = vmul.f32 %v1764_v45, %v3909_v60 }
 0x124   : > { %v1760_v4 = vpop.permute.xlu1 %1759 }
 0x125   : > { %2814 = vmatmul.mubr.msk.f32.gmra.mrb[34].mxu0 %vm1306_vm2, %v1210_v2  ;;  %v1807_v46 = vmul.f32 %v1760_v4, %v3901_v33 }
 0x126   : > { %1725 = vmatprep.mubr.f32.mxu0 %v3337_v55  ;;  %v1772_v48 = vpop.permute.xlu0 %1771 }
 0x127   : > { %v1810_v22 = vmul.f32 %v1772_v48, %v3929_v41 }
 0x128   : > { %v1768_v14 = vpop.permute.xlu1 %1767 }
 0x129   : > { %2815 = vmatmul.mubr.msk.f32.gmra.mrb[36].mxu0 %vm1306_vm2, %v1211_v5  ;;  %v1809_v23 = vmul.f32 %v1768_v14, %v3916_v20 }
 0x12a   : > { %1731 = vmatprep.mubr.f32.mxu0 %v3337_v55  ;;  %v1780_v24 = vpop.permute.xlu0 %1779 }
 0x12b   : > { %v1812_v53 = vmul.f32 %v1780_v24, %v3956_v40 }
 0x12c   : > { %v1776_v62 = vpop.permute.xlu1 %1775 }
 0x12d   : > { %2816 = vmatmul.mubr.msk.f32.gmra.mrb[38].mxu0 %vm1306_vm2, %v1212_v7  ;;  %v1811_v51 = vmul.f32 %v1776_v62, %v3943_v29 }
 0x12e   : > { %1943 = vmatprep.mubr.f32.mxu0 %v3337_v55  ;;  %v1788_v11 = vpop.permute.xlu0 %1787 }
 0x12f   : > { %v1814_v58 = vmul.f32 %v1788_v11, %v3977_v36 }
 0x130   : > { %v1784_v13 = vpop.permute.xlu1 %1783 }
 0x131   : > { %2825 = vmatmul.mubr.msk.f32.vlgmr.msra.gmra.mrb[8].mxu0 %vm1306_vm2, %v1802_v25  ;;  %v1813_v37 = vmul.f32 %v1784_v13, %v3970_v26 }
 0x132   : > { %1949 = vmatprep.mubr.f32.mxu0 %v3337_v55  ;;  %3034 = vmatpush1.bf16.msra.mxu0 %v3033_v12  ;;  %v1796_v63 = vpop.permute.xlu0 %1795 }
 0x133   : > { %2847 = vmatprep.subr.msk.mxu0 %vm1355_vm1, %v2846_v34  ;;  %v1816_v3 = vmul.f32 %v1796_v63, %v3995_v17  ;;  %v2780_v63 = vld [vmem:[%s4665_s7 + $0x58] sm:$0xf] }
 0x134   : > { %v1792_v28 = vpop.permute.xlu1 %1791 }
 0x135   : > { %2826 = vmatmul.mubr.msk.f32.gmra.mrb[10].mxu0 %vm1306_vm2, %v1803_v30  ;;  %v1815_v15 = vmul.f32 %v1792_v28, %v3989_v56 }
 0x136   : > { %1955 = vmatprep.mubr.f32.mxu0 %v3337_v55  ;;  %2848 = vmatpush1.msk.msra.mxu0 %vm1355_vm1, %v2845_v18  ;;  %v2078_v2 = vpop.permute.xlu0 %2077 }
 0x137   : > { %v2137_v32 = vmul.f32 %v2078_v2, %v3846_v47 }
 0x138   : > { %v1800_v21 = vpop.permute.xlu1 %1799 }
 0x139   : > { %2827 = vmatmul.mubr.msk.f32.gmra.mrb[12].mxu0 %vm1306_vm2, %v1804_v44  ;;  %v1817_v4 = vmul.f32 %v1800_v21, %v4001_v19 }
 0x13a   : > { %1961 = vmatprep.mubr.f32.mxu0 %v3337_v55  ;;  %v4083_v14 = vpop.permute.xlu0 %1220 }
 0x13d   : > { %2828 = vmatmul.mubr.msk.f32.gmra.mrb[14].mxu0 %vm1306_vm2, %v1805_v8  ;;  %v2074_v43 = vpop.permute.xlu1 %2073 }
 0x13e   : > { %1967 = vmatprep.mubr.f32.mxu0 %v3337_v55  ;;  %v2136_v6 = vmul.f32 %v2074_v43, %v3835_v57  ;;  %v4088_v10 = vpop.permute.xlu0 %1232 }
 0x141   : > { %2829 = vmatmul.mubr.msk.f32.gmra.mrb[16].mxu0 %vm1306_vm2, %v1806_v42 }
 0x142   : > { %1973 = vmatprep.mubr.f32.mxu0 %v3337_v55  ;;  %v4038_v39 = vpop.permute.xlu1 %1224  ;;  %v2090_v12 = vpop.permute.xlu0 %2089 }
 0x143   : > { %v2140_v34 = vmul.f32 %v2090_v12, %v3893_v0 }
 0x145   : > { %2830 = vmatmul.mubr.msk.f32.gmra.mrb[18].mxu0 %vm1306_vm2, %v1807_v46 }
 0x146   : > { %1979 = vmatprep.mubr.f32.mxu0 %v3337_v55  ;;  %v4043_v49 = vpop.permute.xlu1 %1228  ;;  %v2102_v30 = vpop.permute.xlu0 %2101 }
 0x147   : > { %v2143_v35 = vmul.f32 %v2102_v30, %v3916_v20 }
 0x149   : > { %2831 = vmatmul.mubr.msk.f32.gmra.mrb[20].mxu0 %vm1306_vm2, %v1808_v38 }
 0x14a   : > { %1985 = vmatprep.mubr.f32.mxu0 %v3337_v55  ;;  %v4109_v21 = vpop.permute.xlu0 %1244 }
 0x14b   : > { %v2082_v1 = vpop.permute.xlu1 %2081 }
 0x14c   : > { %v2138_v62 = vmul.f32 %v2082_v1, %v3864_v31  ;;  %v4129_v1 = vld [vmem:[%s4662_s4] ss:$0 sm:$0xff] }
 0x14d   : > { %2832 = vmatmul.mubr.msk.f32.gmra.mrb[22].mxu0 %vm1306_vm2, %v1809_v23 }
 0x14e   : > { %1991 = vmatprep.mubr.f32.mxu0 %v3337_v55  ;;  %v4114_v42 = vpop.permute.xlu0 %1256 }
 0x14f   : > { %v2086_v50 = vpop.permute.xlu1 %2085 }
 0x150   : > { %v2139_v9 = vmul.f32 %v2086_v50, %v3881_v16  ;;  %v2775_v50 = vld [vmem:[%s4665_s7 + $0x30] sm:$0xff] }
 0x151   : > { %2833 = vmatmul.mubr.msk.f32.gmra.mrb[24].mxu0 %vm1306_vm2, %v1810_v22 }
 0x152   : > { %1997 = vmatprep.mubr.f32.mxu0 %v3337_v55  ;;  %v2114_v38 = vpop.permute.xlu0 %2113 }
 0x153   : > { %v2146_v48 = vmul.f32 %v2114_v38, %v3956_v40 }
 0x154   : > { %v4054_v52 = vpop.permute.xlu1 %1236 }
 0x155   : > { %2834 = vmatmul.mubr.msk.f32.gmra.mrb[26].mxu0 %vm1306_vm2, %v1811_v51  ;;  %v2777_v51 = vld [vmem:[%s4665_s7 + $0x40] sm:$0xff] }
 0x156   : > { %2003 = vmatprep.mubr.f32.mxu0 %v3337_v55 }
 0x158   : > { %v4059_v61 = vpop.permute.xlu1 %1240 }
 0x159   : > { %2835 = vmatmul.mubr.msk.f32.gmra.mrb[28].mxu0 %vm1306_vm2, %v1812_v53  ;;  %v4138_v53 = vpop.permute.xlu0 %1268 }
 0x15a   : > { %2009 = vmatprep.mubr.f32.mxu0 %v3337_v55 }
 0x15d   : > { %2836 = vmatmul.mubr.msk.f32.gmra.mrb[30].mxu0 %vm1306_vm2, %v1813_v37  ;;  %v2094_v54 = vpop.permute.xlu1 %2093  ;;  %v2126_v2 = vpop.permute.xlu0 %2125 }
 0x15e   : > { %2015 = vmatprep.mubr.f32.mxu0 %v3337_v55  ;;  %v2141_v18 = vmul.f32 %v2094_v54, %v3901_v33 }
 0x161   : > { %2837 = vmatmul.mubr.msk.f32.gmra.mrb[32].mxu0 %vm1306_vm2, %v1814_v58  ;;  %v2098_v27 = vpop.permute.xlu1 %2097  ;;  %v3021_v58 = vpack.c.bf16 %v2777_v51, %v2775_v50 }
 0x162   : > { %2021 = vmatprep.mubr.f32.mxu0 %v3337_v55  ;;  %v2142_v44 = vmul.f32 %v2098_v27, %v3909_v60 }
 0x165   : > { %2838 = vmatmul.mubr.msk.f32.gmra.mrb[34].mxu0 %vm1306_vm2, %v1815_v15 }
 0x166   : > { %2027 = vmatprep.mubr.f32.mxu0 %v3337_v55  ;;  %v4073_v59 = vpop.permute.xlu1 %1248 }
 0x169   : > { %2839 = vmatmul.mubr.msk.f32.gmra.mrb[36].mxu0 %vm1306_vm2, %v1816_v3 }
 0x16a   : > { %2033 = vmatprep.mubr.f32.mxu0 %v3337_v55  ;;  %v4078_v5 = vpop.permute.xlu1 %1252 }
 0x16d   : > { %2840 = vmatmul.mubr.msk.f32.gmra.mrb[38].mxu0 %vm1306_vm2, %v1817_v4 }
 0x16e   : > { %2277 = vmatprep.mubr.f32.mxu0 %v3337_v55 }
 0x16f   : > { %v2106_v7 = vpop.permute.xlu1 %2105 }
 0x170   : > { %v2144_v43 = vmul.f32 %v2106_v7, %v3929_v41 }
 0x171   : > { %2849 = vmatmul.mubr.msk.f32.vlgmr.msra.gmra.mrb[8].mxu0 %vm1306_vm2, %v2136_v6 }
 0x172   : > { %2283 = vmatprep.mubr.f32.mxu0 %v3337_v55 }
 0x173   : > { %v2110_v25 = vpop.permute.xlu1 %2109 }
 0x174   : > { %v2145_v45 = vmul.f32 %v2110_v25, %v3943_v29 }
 0x175   : > { %2850 = vmatmul.mubr.msk.f32.gmra.mrb[10].mxu0 %vm1306_vm2, %v2137_v32 }
 0x176   : > { %2289 = vmatprep.mubr.f32.mxu0 %v3337_v55 }
 0x178   : > { %v4096_v13 = vpop.permute.xlu1 %1260 }
 0x179   : > { %2851 = vmatmul.mubr.msk.f32.gmra.mrb[12].mxu0 %vm1306_vm2, %v2138_v62  ;;  %v2779_v62 = vld [vmem:[%s4665_s7 + $0x50] sm:$0xf] }
 0x17a   : > { %2295 = vmatprep.mubr.f32.mxu0 %v3337_v55 }
 0x17c   : > { %v4104_v28 = vpop.permute.xlu1 %1264 }
 0x17d   : > { %2852 = vmatmul.mubr.msk.f32.gmra.mrb[14].mxu0 %vm1306_vm2, %v2139_v9  ;;  %v2149_v9 = vmul.f32 %v2126_v2, %v3989_v56 }
 0x17e   : > { %2301 = vmatprep.mubr.f32.mxu0 %v3337_v55 }
 0x181   : > { %2853 = vmatmul.mubr.msk.f32.gmra.mrb[16].mxu0 %vm1306_vm2, %v2140_v34  ;;  %v2118_v8 = vpop.permute.xlu1 %2117 }
 0x182   : > { %2307 = vmatprep.mubr.f32.mxu0 %v3337_v55  ;;  %v2147_v37 = vmul.f32 %v2118_v8, %v3970_v26 }
 0x185   : > { %2854 = vmatmul.mubr.msk.f32.gmra.mrb[18].mxu0 %vm1306_vm2, %v2141_v18  ;;  %v2122_v46 = vpop.permute.xlu1 %2121 }
 0x186   : > { %2313 = vmatprep.mubr.f32.mxu0 %v3337_v55  ;;  %v2148_v3 = vmul.f32 %v2122_v46, %v3977_v36 }
 0x189   : > { %2855 = vmatmul.mubr.msk.f32.gmra.mrb[20].mxu0 %vm1306_vm2, %v2142_v44 }
 0x18a   : > { %2319 = vmatprep.mubr.f32.mxu0 %v3337_v55  ;;  %v4122_v23 = vpop.permute.xlu1 %1272 }
 0x18d   : > { %2856 = vmatmul.mubr.msk.f32.gmra.mrb[22].mxu0 %vm1306_vm2, %v2143_v35 }
 0x18e   : > { %2325 = vmatprep.mubr.f32.mxu0 %v3337_v55  ;;  %v4144_v54 = vpop.permute.xlu1 %1276 }
 0x191   : > { %2857 = vmatmul.mubr.msk.f32.gmra.mrb[24].mxu0 %vm1306_vm2, %v2144_v43 }
 0x192   : > { %2331 = vmatprep.mubr.f32.mxu0 %v3337_v55 }
 0x193   : > { %v2130_v32 = vpop.permute.xlu1 %2129 }
 0x194   : > { %v2150_v30 = vmul.f32 %v2130_v32, %v3995_v17 }
 0x195   : > { %2858 = vmatmul.mubr.msk.f32.gmra.mrb[26].mxu0 %vm1306_vm2, %v2145_v45 }
 0x196   : > { %2337 = vmatprep.mubr.f32.mxu0 %v3337_v55 }
 0x197   : > { %v2981_v22 = vpop.f32.mrb[0].mxu0  ;;  %v2134_v18 = vpop.permute.xlu1 %2133 }
 0x198   : > { %v761_v24 = vpop.f32.mrb[1].mxu0  ;;  %v767_v15 = vadd.f32 %v2981_v22, %v4129_v1  ;;  %v2151_v46 = vmul.f32 %v2134_v18, %v4001_v19 }
 0x199   : > { %v762_v11 = vadd.f32 %v4129_v1, %v761_v24  ;;  %2859 = vmatmul.mubr.msk.f32.gmra.mrb[28].mxu0 %vm1306_vm2, %v2146_v48 }
 0x19a   : > { %2343 = vmatprep.mubr.f32.mxu0 %v3337_v55  ;;  %v841_v4 = vmax.f32 %v767_v15, 0.0 }
 0x19b   : > { %v840_v27 = vmax.f32 %v762_v11, 0.0 }
 0x19d   : > { %2759 = vmatmul.mubr.msk.f32.vlgmr.msra.gmra.mrb[8].mxu1 %vm394_vm0, %v840_v27  ;;  %2860 = vmatmul.mubr.msk.f32.gmra.mrb[30].mxu0 %vm1306_vm2, %v2147_v37 }
 0x19e   : > { %3022 = vmatpush1.bf16.msra.mxu1 %v3021_v58  ;;  %994 = vmatprep.mubr.f32.mxu1 %v3337_v55 }
 0x19f   : > { %v2984_v6 = vpop.f32.mrb[2].mxu0  ;;  %2349 = vmatprep.mubr.f32.mxu0 %v3337_v55  ;;  %2781 = vmatprep.subr.msk.mxu1 %vm1355_vm1, %v2780_v63 }
 0x1a0   : > { %v771_v7 = vpop.f32.mrb[3].mxu0  ;;  %v777_v12 = vadd.f32 %v2984_v6, %v4129_v1 }
 0x1a1   : > { %v772_v25 = vadd.f32 %v4129_v1, %v771_v7  ;;  %2760 = vmatmul.mubr.msk.f32.gmra.mrb[10].mxu1 %vm394_vm0, %v841_v4  ;;  %2861 = vmatmul.mubr.msk.f32.gmra.mrb[32].mxu0 %vm1306_vm2, %v2148_v3 }
 0x1a2   : > { %1000 = vmatprep.mubr.f32.mxu1 %v3337_v55  ;;  %2355 = vmatprep.mubr.f32.mxu0 %v3337_v55  ;;  %v843_v44 = vmax.f32 %v777_v12, 0.0 }
 0x1a3   : > { %v842_v34 = vmax.f32 %v772_v25, 0.0  ;;  %2782 = vmatpush1.msk.msra.mxu1 %vm1355_vm1, %v2779_v62 }
 0x1a5   : > { %2761 = vmatmul.mubr.msk.f32.gmra.mrb[12].mxu1 %vm394_vm0, %v842_v34  ;;  %2862 = vmatmul.mubr.msk.f32.gmra.mrb[34].mxu0 %vm1306_vm2, %v2149_v9 }
 0x1a6   : > { %1006 = vmatprep.mubr.f32.mxu1 %v3337_v55  ;;  %2361 = vmatprep.mubr.f32.mxu0 %v3337_v55 }
 0x1a7   : > { %v2987_v8 = vpop.f32.mrb[4].mxu0 }
 0x1a8   : > { %v781_v35 = vpop.f32.mrb[5].mxu0  ;;  %v787_v45 = vadd.f32 %v2987_v8, %v4129_v1 }
 0x1a9   : > { %v782_v43 = vadd.f32 %v4129_v1, %v781_v35  ;;  %2762 = vmatmul.mubr.msk.f32.gmra.mrb[14].mxu1 %vm394_vm0, %v843_v44  ;;  %2863 = vmatmul.mubr.msk.f32.gmra.mrb[36].mxu0 %vm1306_vm2, %v2150_v30 }
 0x1aa   : > { %1012 = vmatprep.mubr.f32.mxu1 %v3337_v55  ;;  %2367 = vmatprep.mubr.f32.mxu0 %v3337_v55  ;;  %v845_v48 = vmax.f32 %v787_v45, 0.0 }
 0x1ab   : > { %v844_v38 = vmax.f32 %v782_v43, 0.0 }
 0x1ad   : > { %2763 = vmatmul.mubr.msk.f32.gmra.mrb[16].mxu1 %vm394_vm0, %v844_v38  ;;  %2864 = vmatmul.mubr.msk.f32.gmra.mrb[38].mxu0 %vm1306_vm2, %v2151_v46 }
 0x1ae   : > { %1018 = vmatprep.mubr.f32.mxu1 %v3337_v55 }
 0x1af   : > { %v2990_v22 = vpop.f32.mrb[6].mxu0 }
 0x1b0   : > { %v791_v50 = vpop.f32.mrb[7].mxu0  ;;  %v797_v24 = vadd.f32 %v2990_v22, %v4129_v1  ;;  %v1285_v22 = vmul.f32 %v4043_v49, %v3864_v31  ;;  %v1288_v31 = vmul.f32 %v4059_v61, %v3901_v33  ;;  %v2438_v33 = vld [vmem:[%s4666_s8] sm:$0xff] }
 0x1b1   : > { %v792_v51 = vadd.f32 %v4129_v1, %v791_v50  ;;  %2764 = vmatmul.mubr.msk.f32.gmra.mrb[18].mxu1 %vm394_vm0, %v845_v48  ;;  %v1283_v48 = vmul.f32 %v4083_v14, %v3835_v57  ;;  %v1286_v57 = vmul.f32 %v4088_v10, %v3881_v16  ;;  %v2454_v16 = vld [vmem:[%s4666_s8 + $0x80] sm:$0xff]  ;;  %v1291_v14 = vmul.f32 %v4078_v5, %v3929_v41  ;;  %v2440_v10 = vld [vmem:[%s4666_s8 + $0x10] sm:$0xff]  ;;  %v2441_v5 = vld [vmem:[%s4666_s8 + $0x18] sm:$0xff] }
 0x1b2   : > { %1024 = vmatprep.mubr.f32.mxu1 %v3337_v55  ;;  %v847_v11 = vmax.f32 %v797_v24, 0.0  ;;  %v3041_v50 = vpack.c.bf16 %v2441_v5, %v2440_v10  ;;  %v2442_v24 = vld [vmem:[%s4666_s8 + $0x20] sm:$0xff] }
 0x1b3   : > { %v846_v37 = vmax.f32 %v792_v51, 0.0  ;;  %v1293_v51 = vmul.f32 %v4096_v13, %v3956_v40  ;;  %v2443_v13 = vld [vmem:[%s4666_s8 + $0x28] sm:$0xff] }
 0x1b5   : > { %2765 = vmatmul.mubr.msk.f32.gmra.mrb[20].mxu1 %vm394_vm0, %v846_v37  ;;  %v1294_v37 = vmul.f32 %v4104_v28, %v3970_v26  ;;  %v2460_v26 = vld [vmem:[%s4666_s8 + $0xb0] sm:$0xff]  ;;  %v2461_v28 = vld [vmem:[%s4666_s8 + $0xb8] sm:$0xff] }
 0x1b6   : > { %1030 = vmatprep.mubr.f32.mxu1 %v3337_v55 }
 0x1b7   : > { %v2993_v58 = vpop.f32.mrb[0].mxu1 }
 0x1b8   : > { %v801_v15 = vpop.f32.mrb[1].mxu1  ;;  %v807_v63 = vadd.f32 %v2993_v58, %v4129_v1  ;;  %v1295_v58 = vmul.f32 %v4138_v53, %v3977_v36  ;;  %v2444_v36 = vld [vmem:[%s4666_s8 + $0x30] sm:$0xff]  ;;  %v1296_v53 = vmul.f32 %v4122_v23, %v3989_v56  ;;  %v2462_v23 = vld [vmem:[%s4666_s8 + $0xc0] sm:$0xff] }
 0x1b9   : > { %v802_v27 = vadd.f32 %v4129_v1, %v801_v15  ;;  %2766 = vmatmul.mubr.msk.f32.gmra.mrb[22].mxu1 %vm394_vm0, %v847_v11  ;;  %v3045_v11 = vpack.c.bf16 %v2443_v13, %v2442_v24  ;;  %v3047_v15 = vpack.c.bf16 %v2461_v28, %v2460_v26 }
 0x1ba   : > { %1036 = vmatprep.mubr.f32.mxu1 %v3337_v55  ;;  %v849_v2 = vmax.f32 %v807_v63, 0.0 }
 0x1bb   : > { %v848_v3 = vmax.f32 %v802_v27, 0.0  ;;  %v2445_v27 = vld [vmem:[%s4666_s8 + $0x38] sm:$0xff] }
 0x1bc   : > { %v3049_v63 = vpack.c.bf16 %v2445_v27, %v2444_v36 }
 0x1bd   : > { %2767 = vmatmul.mubr.msk.f32.gmra.mrb[24].mxu1 %vm394_vm0, %v848_v3  ;;  %v1281_v3 = vpop.permute.xlu0 %1280 }
 0x1be   : > { %1042 = vmatprep.mubr.f32.mxu1 %v3337_v55  ;;  %v1298_v56 = vmul.f32 %v1281_v3, %v4001_v19 }
 0x1bf   : > { %v2996_v4 = vpop.f32.mrb[2].mxu1 }
 0x1c0   : > { %v811_v6 = vpop.f32.mrb[3].mxu1  ;;  %v817_v32 = vadd.f32 %v2996_v4, %v4129_v1  ;;  %v2463_v4 = vld [vmem:[%s4666_s8 + $0xc8] sm:$0xff] }
 0x1c1   : > { %v812_v7 = vadd.f32 %v4129_v1, %v811_v6  ;;  %2768 = vmatmul.mubr.msk.f32.gmra.mrb[26].mxu1 %vm394_vm0, %v849_v2  ;;  %v1297_v2 = vmul.f32 %v4144_v54, %v3995_v17  ;;  %v2446_v6 = vld [vmem:[%s4666_s8 + $0x40] sm:$0xff]  ;;  %v2447_v17 = vld [vmem:[%s4666_s8 + $0x48] sm:$0xff]  ;;  %v2465_v54 = vld [vmem:[%s4666_s8 + $0xd8] sm:$0xff] }
 0x1c2   : > { %1048 = vmatprep.mubr.f32.mxu1 %v3337_v55  ;;  %v851_v25 = vmax.f32 %v817_v32, 0.0  ;;  %v3053_v19 = vpack.c.bf16 %v2447_v17, %v2446_v6  ;;  %v2448_v32 = vld [vmem:[%s4666_s8 + $0x50] sm:$0xff] }
 0x1c3   : > { %v850_v62 = vmax.f32 %v812_v7, 0.0  ;;  %v3051_v7 = vpack.c.bf16 %v2463_v4, %v2462_v23 }
 0x1c5   : > { %2769 = vmatmul.mubr.msk.f32.gmra.mrb[28].mxu1 %vm394_vm0, %v850_v62 }
 0x1c6   : > { %1054 = vmatprep.mubr.f32.mxu1 %v3337_v55 }
 0x1c7   : > { %v2999_v9 = vpop.f32.mrb[4].mxu1 }
 0x1c8   : > { %v821_v12 = vpop.f32.mrb[5].mxu1  ;;  %v827_v30 = vadd.f32 %v2999_v9, %v4129_v1 }
 0x1c9   : > { %v822_v34 = vadd.f32 %v4129_v1, %v821_v12  ;;  %2770 = vmatmul.mubr.msk.f32.gmra.mrb[30].mxu1 %vm394_vm0, %v851_v25  ;;  %v2449_v25 = vld [vmem:[%s4666_s8 + $0x58] sm:$0xff]  ;;  %v2466_v12 = vld [vmem:[%s4666_s8 + $0xe0] sm:$0xff] }
 0x1ca   : > { %1060 = vmatprep.mubr.f32.mxu1 %v3337_v55  ;;  %v853_v44 = vmax.f32 %v827_v30, 0.0  ;;  %v3057_v9 = vpack.c.bf16 %v2449_v25, %v2448_v32  ;;  %v2450_v30 = vld [vmem:[%s4666_s8 + $0x60] sm:$0xff] }
 0x1cb   : > { %v852_v18 = vmax.f32 %v822_v34, 0.0  ;;  %v2467_v34 = vld [vmem:[%s4666_s8 + $0xe8] sm:$0xff] }
 0x1cd   : > { %2771 = vmatmul.mubr.msk.f32.gmra.mrb[32].mxu1 %vm394_vm0, %v852_v18  ;;  %v3059_v18 = vpack.c.bf16 %v2467_v34, %v2466_v12 }
 0x1ce   : > { %1066 = vmatprep.mubr.f32.mxu1 %v3337_v55 }
 0x1cf   : > { %v3002_v8 = vpop.f32.mrb[6].mxu1 }
 0x1d0   : > { %v831_v35 = vpop.f32.mrb[7].mxu1  ;;  %v837_v46 = vadd.f32 %v3002_v8, %v4129_v1 }
 0x1d1   : > { %v832_v43 = vadd.f32 %v4129_v1, %v831_v35  ;;  %2772 = vmatmul.mubr.msk.f32.gmra.mrb[34].mxu1 %vm394_vm0, %v853_v44  ;;  %v1284_v1 = vmul.f32 %v4038_v39, %v3846_v47  ;;  %v1287_v47 = vmul.f32 %v4054_v52, %v3893_v0  ;;  %v1289_v39 = vmul.f32 %v4109_v21, %v3909_v60  ;;  %v2455_v0 = vld [vmem:[%s4666_s8 + $0x88] sm:$0xff]  ;;  %v2468_v35 = vld [vmem:[%s4666_s8 + $0xf0] sm:$0xff] }
 0x1d2   : > { %1072 = vmatprep.mubr.f32.mxu1 %v3337_v55  ;;  %v855_v38 = vmax.f32 %v837_v46, 0.0  ;;  %v1290_v60 = vmul.f32 %v4073_v59, %v3916_v20  ;;  %v3035_v49 = vpack.c.bf16 %v2455_v0, %v2454_v16  ;;  %v2439_v52 = vld [vmem:[%s4666_s8 + $0x8] sm:$0xff]  ;;  %v2456_v20 = vld [vmem:[%s4666_s8 + $0x90] sm:$0xff]  ;;  %v2457_v59 = vld [vmem:[%s4666_s8 + $0x98] sm:$0xff]  ;;  %v1292_v21 = vmul.f32 %v4114_v42, %v3943_v29 }
 0x1d3   : > { %v854_v45 = vmax.f32 %v832_v43, 0.0  ;;  %v3037_v61 = vpack.c.bf16 %v2439_v52, %v2438_v33  ;;  %v3039_v41 = vpack.c.bf16 %v2457_v59, %v2456_v20  ;;  %v2458_v29 = vld [vmem:[%s4666_s8 + $0xa0] sm:$0xff]  ;;  %v2459_v42 = vld [vmem:[%s4666_s8 + $0xa8] sm:$0xff]  ;;  %v2469_v43 = vld [vmem:[%s4666_s8 + $0xf8] sm:$0xff] }
 0x1d4   : > { %3036 = vmatprep.subr.bf16.mxu1 %v3035_v49  ;;  %v3043_v40 = vpack.c.bf16 %v2459_v42, %v2458_v29  ;;  %v2451_v44 = vld [vmem:[%s4666_s8 + $0x68] sm:$0xff]  ;;  %v2452_v46 = vld [vmem:[%s4666_s8 + $0x70] sm:$0xff] }
 0x1d5   : > { %2773 = vmatmul.mubr.msk.f32.gmra.mrb[36].mxu1 %vm394_vm0, %v854_v45  ;;  %v3061_v8 = vpack.c.bf16 %v2451_v44, %v2450_v30  ;;  %v3063_v45 = vpack.c.bf16 %v2469_v43, %v2468_v35 }
 0x1d6   : > { %1078 = vmatprep.mubr.f32.mxu1 %v3337_v55 }
 0x1d9   : > { %2774 = vmatmul.mubr.msk.f32.gmra.mrb[38].mxu1 %vm394_vm0, %v855_v38  ;;  %v2453_v38 = vld [vmem:[%s4666_s8 + $0x78] sm:$0xff] }
 0x1da   : > { %1426 = vmatprep.mubr.f32.mxu1 %v3337_v55 }
 0x1dd   : > { %2783 = vmatmul.mubr.msk.f32.vlgmr.msra.gmra.mrb[40].mxu1 %vm1306_vm2, %v1283_v48  ;;  %v3065_v48 = vpack.c.bf16 %v2453_v38, %v2452_v46 }
 0x1de   : > { %1432 = vmatprep.mubr.f32.mxu1 %v3337_v55  ;;  %3038 = vmatpush3.bf16.msra.mxu1 %v3037_v61 }
 0x1df   : > { %3040 = vmatprep.subr.bf16.mxu1 %v3039_v41 }
 0x1e1   : > { %2784 = vmatmul.mubr.msk.f32.gmra.mrb[42].mxu1 %vm1306_vm2, %v1284_v1 }
 0x1e2   : > { %1438 = vmatprep.mubr.f32.mxu1 %v3337_v55  ;;  %3042 = vmatpush3.bf16.msra.mxu1 %v3041_v50 }
 0x1e3   : > { %3044 = vmatprep.subr.bf16.mxu1 %v3043_v40 }
 0x1e5   : > { %2785 = vmatmul.mubr.msk.f32.gmra.mrb[44].mxu1 %vm1306_vm2, %v1285_v22 }
 0x1e6   : > { %1444 = vmatprep.mubr.f32.mxu1 %v3337_v55  ;;  %3046 = vmatpush3.bf16.msra.mxu1 %v3045_v11 }
 0x1e7   : > { %3048 = vmatprep.subr.bf16.mxu1 %v3047_v15 }
 0x1e9   : > { %2786 = vmatmul.mubr.msk.f32.gmra.mrb[46].mxu1 %vm1306_vm2, %v1286_v57 }
 0x1ea   : > { %1450 = vmatprep.mubr.f32.mxu1 %v3337_v55  ;;  %3050 = vmatpush3.bf16.msra.mxu1 %v3049_v63 }
 0x1eb   : > { %3052 = vmatprep.subr.bf16.mxu1 %v3051_v7 }
 0x1ed   : > { %2787 = vmatmul.mubr.msk.f32.gmra.mrb[48].mxu1 %vm1306_vm2, %v1287_v47 }
 0x1ee   : > { %1456 = vmatprep.mubr.f32.mxu1 %v3337_v55  ;;  %3054 = vmatpush3.bf16.msra.mxu1 %v3053_v19 }
 0x1f1   : > { %2788 = vmatmul.mubr.msk.f32.gmra.mrb[50].mxu1 %vm1306_vm2, %v1288_v31 }
 0x1f2   : > { %1462 = vmatprep.mubr.f32.mxu1 %v3337_v55 }
 0x1f5   : > { %2789 = vmatmul.mubr.msk.f32.gmra.mrb[52].mxu1 %vm1306_vm2, %v1289_v39 }
 0x1f6   : > { %1468 = vmatprep.mubr.f32.mxu1 %v3337_v55 }
 0x1f9   : > { %2790 = vmatmul.mubr.msk.f32.gmra.mrb[54].mxu1 %vm1306_vm2, %v1290_v60 }
 0x1fa   : > { %1474 = vmatprep.mubr.f32.mxu1 %v3337_v55 }
 0x1fd   : > { %2791 = vmatmul.mubr.msk.f32.gmra.mrb[56].mxu1 %vm1306_vm2, %v1291_v14 }
 0x1fe   : > { %1480 = vmatprep.mubr.f32.mxu1 %v3337_v55 }
 0x201   : > { %2792 = vmatmul.mubr.msk.f32.gmra.mrb[58].mxu1 %vm1306_vm2, %v1292_v21 }
 0x202   : > { %1486 = vmatprep.mubr.f32.mxu1 %v3337_v55 }
 0x205   : > { %2793 = vmatmul.mubr.msk.f32.gmra.mrb[60].mxu1 %vm1306_vm2, %v1293_v51 }
 0x206   : > { %1492 = vmatprep.mubr.f32.mxu1 %v3337_v55 }
 0x209   : > { %2794 = vmatmul.mubr.msk.f32.gmra.mrb[62].mxu1 %vm1306_vm2, %v1294_v37 }
 0x20a   : > { %1498 = vmatprep.mubr.f32.mxu1 %v3337_v55 }
 0x20d   : > { %2795 = vmatmul.mubr.msk.f32.gmra.mrb[64].mxu1 %vm1306_vm2, %v1295_v58 }
 0x20e   : > { %1504 = vmatprep.mubr.f32.mxu1 %v3337_v55 }
 0x211   : > { %2796 = vmatmul.mubr.msk.f32.gmra.mrb[66].mxu1 %vm1306_vm2, %v1296_v53 }
 0x212   : > { %1510 = vmatprep.mubr.f32.mxu1 %v3337_v55 }
 0x215   : > { %2797 = vmatmul.mubr.msk.f32.gmra.mrb[68].mxu1 %vm1306_vm2, %v1297_v2 }
 0x216   : > { %1516 = vmatprep.mubr.f32.mxu1 %v3337_v55  ;;  %v2464_v55 = vld [vmem:[%s4666_s8 + $0xd0] sm:$0xff] }
 0x217   : > { %v3055_v62 = vpack.c.bf16 %v2465_v54, %v2464_v55 }
 0x219   : > { %2798 = vmatmul.mubr.msk.f32.gmra.mrb[70].mxu1 %vm1306_vm2, %v1298_v56  ;;  %3056 = vmatprep.subr.bf16.mxu1 %v3055_v62 }
 0x21a   : > { %3058 = vmatpush3.bf16.msra.mxu1 %v3057_v9 }
 0x21b   : > { %3060 = vmatprep.subr.bf16.mxu1 %v3059_v18 }
 0x21e   : > { %3062 = vmatpush3.bf16.msra.mxu1 %v3061_v8  ;;  %v866_v8 = vlaneseq }
 0x21f   : > { %3064 = vmatprep.subr.bf16.mxu1 %v3063_v45 }
 0x220   : > { %v867_v46 = vshrl.u32 %v866_v8, 7 }
 0x222   : > { %3066 = vmatpush3.bf16.msra.mxu1 %v3065_v48  ;;  %v868_v48 = vsub.s32 0, %v867_v46 }
 0x244   : > { %v4372_v1 = vpop.f32.mrb[8].mxu0 }
 0x245   : > { %v4374_v22 = vpop.f32.mrb[9].mxu0 }
 0x248   : > { %v4376_v57 = vpop.f32.mrb[10].mxu0 }
 0x249   : > { %v4378_v47 = vpop.f32.mrb[11].mxu0 }
 0x24c   : > { %v4380_v31 = vpop.f32.mrb[12].mxu0 }
 0x24d   : > { %v4382_v39 = vpop.f32.mrb[13].mxu0 }
 0x250   : > { %v4384_v16 = vpop.f32.mrb[14].mxu0 }
 0x251   : > { %v4386_v0 = vpop.f32.mrb[15].mxu0 }
 0x254   : > { %v4388_v33 = vpop.f32.mrb[16].mxu0 }
 0x255   : > { %v4390_v60 = vpop.f32.mrb[17].mxu0 }
 0x258   : > { %v4392_v49 = vpop.f32.mrb[18].mxu0 }
 0x259   : > { %v4394_v52 = vpop.f32.mrb[19].mxu0 }
 0x25c   : > { %v4396_v61 = vpop.f32.mrb[20].mxu0 }
 0x25d   : > { %v4398_v14 = vpop.f32.mrb[21].mxu0 }
 0x260   : > { %v4400_v20 = vpop.f32.mrb[22].mxu0 }
 0x261   : > { %v4402_v59 = vpop.f32.mrb[23].mxu0 }
 0x264   : > { %v4404_v10 = vpop.f32.mrb[24].mxu0 }
 0x265   : > { %v4406_v21 = vpop.f32.mrb[25].mxu0 }
 0x268   : > { %v4408_v41 = vpop.f32.mrb[26].mxu0 }
 0x269   : > { %v4410_v5 = vpop.f32.mrb[27].mxu0 }
 0x26c   : > { %v4412_v50 = vpop.f32.mrb[28].mxu0 }
 0x26d   : > { %v4414_v51 = vpop.f32.mrb[29].mxu0 }
 0x270   : > { %v990_v29 = vpop.f32.mrb[8].mxu1  ;;  %v4416_v42 = vpop.f32.mrb[30].mxu0 }
 0x271   : > { %v992_v24 = vpop.f32.mrb[9].mxu1  ;;  %v4418_v37 = vpop.f32.mrb[31].mxu0 }
 0x274   : > { %v996_v40 = vpop.f32.mrb[10].mxu1  ;;  %v4420_v13 = vpop.f32.mrb[32].mxu0 }
 0x275   : > { %4670 = vst [vmem:[#allocation5_spill] sm:$0xff] %v4420_v13  ;;  %v998_v11 = vpop.f32.mrb[11].mxu1  ;;  %v4422_v58 = vpop.f32.mrb[33].mxu0 }
 0x276   : > { %4671 = vst [vmem:[#allocation6_spill] sm:$0xff] %v4422_v58 }
 0x278   : > { %v1002_v26 = vpop.f32.mrb[12].mxu1  ;;  %v4424_v28 = vpop.f32.mrb[34].mxu0 }
 0x279   : > { %4672 = vst [vmem:[#allocation7_spill] sm:$0xff] %v4424_v28  ;;  %v1004_v36 = vpop.f32.mrb[13].mxu1  ;;  %v4426_v53 = vpop.f32.mrb[35].mxu0 }
 0x27a   : > { %4673 = vst [vmem:[#allocation8_spill] sm:$0xff] %v4426_v53 }
 0x27c   : > { %v4428_v15 = vpop.f32.mrb[14].mxu1  ;;  %v4430_v27 = vpop.f32.mrb[36].mxu0 }
 0x27d   : > { %4674 = vst [vmem:[#allocation9_spill] sm:$0xff] %v4430_v27  ;;  %v4432_v63 = vpop.f32.mrb[15].mxu1  ;;  %v4434_v3 = vpop.f32.mrb[37].mxu0 }
 0x27e   : > { %4675 = vst [vmem:[#allocation10_spill] sm:$0xff] %v4434_v3  ;;  %v872_v3 = vsub.s32 1, %v867_v46 }
 0x280   : > { %v4436_v2 = vpop.f32.mrb[16].mxu1  ;;  %v4438_v56 = vpop.f32.mrb[38].mxu0 }
 0x281   : > { %4676 = vst [vmem:[#allocation11_spill] sm:$0xff] %v4438_v56  ;;  %v4440_v23 = vpop.f32.mrb[17].mxu1  ;;  %v4442_v4 = vpop.f32.mrb[39].mxu0  ;;  %v864_v56 = vld [vmem:[%s4664_s6] sm:$0x3] }
 0x282   : > { %4677 = vst [vmem:[#allocation12_spill] sm:$0xff] %v4442_v4  ;;  %v4489_v53 = vrot.slane %v864_v56, %v868_v48 }
 0x284   : > { %v4444_v6 = vpop.f32.mrb[18].mxu1  ;;  %v997_v48 = vadd.f32 %v996_v40, %v4489_v53 }
 0x285   : > { %v4446_v7 = vpop.f32.mrb[19].mxu1 }
 0x288   : > { %v4448_v17 = vpop.f32.mrb[20].mxu1 }
 0x289   : > { %v4450_v19 = vpop.f32.mrb[21].mxu1 }
 0x28c   : > { %v4452_v55 = vpop.f32.mrb[22].mxu1 }
 0x28d   : > { %v4454_v54 = vpop.f32.mrb[23].mxu1 }
 0x290   : > { %v4456_v32 = vpop.f32.mrb[24].mxu1 }
 0x291   : > { %v4458_v62 = vpop.f32.mrb[25].mxu1 }
 0x294   : > { %v4460_v25 = vpop.f32.mrb[26].mxu1 }
 0x295   : > { %v4462_v9 = vpop.f32.mrb[27].mxu1 }
 0x298   : > { %v4464_v12 = vpop.f32.mrb[28].mxu1 }
 0x299   : > { %v4466_v34 = vpop.f32.mrb[29].mxu1 }
 0x29c   : > { %v4468_v30 = vpop.f32.mrb[30].mxu1 }
 0x29d   : > { %v4470_v18 = vpop.f32.mrb[31].mxu1 }
 0x2a0   : > { %v4472_v44 = vpop.f32.mrb[32].mxu1 }
 0x2a1   : > { %4678 = vst [vmem:[#allocation13_spill] sm:$0xff] %v4472_v44  ;;  %v4474_v35 = vpop.f32.mrb[33].mxu1 }
 0x2a2   : > { %4679 = vst [vmem:[#allocation14_spill] sm:$0xff] %v4474_v35 }
 0x2a4   : > { %v4476_v43 = vpop.f32.mrb[34].mxu1 }
 0x2a5   : > { %4680 = vst [vmem:[#allocation15_spill] sm:$0xff] %v4476_v43  ;;  %v4478_v45 = vpop.f32.mrb[35].mxu1  ;;  %v4493_v43 = vrot.slane %v864_v56, %v872_v3 }
 0x2a6   : > { %4681 = vst [vmem:[#allocation16_spill] sm:$0xff] %v4478_v45  ;;  %v991_v45 = vadd.f32 %v990_v29, %v4489_v53 }
 0x2a7   : > { %v999_v3 = vadd.f32 %v998_v11, %v4493_v43 }
 0x2a8   : > { %v4480_v38 = vpop.f32.mrb[36].mxu1 }
 0x2a9   : > { %4682 = vst [vmem:[#allocation17_spill] sm:$0xff] %v4480_v38  ;;  %v4482_v4 = vpop.f32.mrb[37].mxu1 }
 0x2aa   : > { %4683 = vst [vmem:[#allocation18_spill] sm:$0xff] %v4482_v4  ;;  %v993_v4 = vadd.f32 %v992_v24, %v4493_v43  ;;  %v1003_v24 = vadd.f32 %v1002_v26, %v4489_v53  ;;  %v1011_v26 = vadd.f32 %v4432_v63, %v4493_v43 }
 0x2ac   : > { %v4487_v27 = vpop.f32.mrb[38].mxu1 }
 0x2ad   : > { %4684 = vst [vmem:[#allocation19_spill] sm:$0xff] %v4487_v27  ;;  %v4491_v28 = vpop.f32.mrb[39].mxu1 }
 0x2ae   : > { %4685 = vst [vmem:[#allocation20_spill] sm:$0xff] %v4491_v28 }
 0x2b0   : > { %v1428_v8 = vpop.f32.mrb[40].mxu1 }
 0x2b1   : > { %v3071_v38 = vadd.f32 %v4372_v1, %v1428_v8  ;;  %v1430_v58 = vpop.f32.mrb[41].mxu1 }
 0x2b2   : > { %v3072_v35 = vadd.f32 %v4374_v22, %v1430_v58 }
 0x2b3   : > { %v2406_v13 = vmul.f32 %v3071_v38, %v991_v45 }
 0x2b4   : > { %v2407_v46 = vmul.f32 %v3072_v35, %v993_v4  ;;  %v1434_v44 = vpop.f32.mrb[42].mxu1  ;;  %v1005_v4 = vadd.f32 %v1004_v36, %v4493_v43  ;;  %v1015_v35 = vadd.f32 %v4436_v2, %v4489_v53 }
 0x2b5   : > { %v3073_v27 = vadd.f32 %v4376_v57, %v1434_v44  ;;  %v1436_v28 = vpop.f32.mrb[43].mxu1 }
 0x2b6   : > { %v3074_v56 = vadd.f32 %v4378_v47, %v1436_v28  ;;  %2534 = vmatprep.mubr.f32.mxu1 %v2407_v46  ;;  %v1009_v47 = vadd.f32 %v4428_v15, %v4489_v53 }
 0x2b7   : > { %v2408_v29 = vmul.f32 %v3073_v27, %v997_v48  ;;  %2535 = vmatmul.mubr.f32.vlgmr.msra.gmra.mrb[72].mxu1 %v2406_v13  ;;  %v1021_v48 = vadd.f32 %v4444_v6, %v4489_v53 }
 0x2b8   : > { %v2409_v1 = vmul.f32 %v3074_v56, %v999_v3  ;;  %v1440_v8 = vpop.f32.mrb[44].mxu1 }
 0x2b9   : > { %v3075_v22 = vadd.f32 %v4380_v31, %v1440_v8  ;;  %v1442_v58 = vpop.f32.mrb[45].mxu1 }
 0x2ba   : > { %v3076_v40 = vadd.f32 %v4382_v39, %v1442_v58  ;;  %2539 = vmatprep.mubr.f32.mxu1 %v2409_v1  ;;  %v1027_v1 = vadd.f32 %v4448_v17, %v4489_v53  ;;  %v1033_v58 = vadd.f32 %v4452_v55, %v4489_v53 }
 0x2bb   : > { %v2410_v57 = vmul.f32 %v3075_v22, %v1003_v24  ;;  %2540 = vmatmul.mubr.f32.gmra.mrb[74].mxu1 %v2408_v29 }
 0x2bc   : > { %v2411_v11 = vmul.f32 %v3076_v40, %v1005_v4  ;;  %v1446_v44 = vpop.f32.mrb[46].mxu1 }
 0x2bd   : > { %v3077_v13 = vadd.f32 %v4384_v16, %v1446_v44  ;;  %v1448_v28 = vpop.f32.mrb[47].mxu1  ;;  %v1017_v16 = vadd.f32 %v4440_v23, %v4493_v43 }
 0x2be   : > { %v3078_v31 = vadd.f32 %v4386_v0, %v1448_v28  ;;  %2544 = vmatprep.mubr.f32.mxu1 %v2411_v11  ;;  %v1039_v11 = vadd.f32 %v4456_v32, %v4489_v53  ;;  %v1045_v28 = vadd.f32 %v4460_v25, %v4489_v53 }
 0x2bf   : > { %v2412_v36 = vmul.f32 %v3077_v13, %v1009_v47  ;;  %2545 = vmatmul.mubr.f32.gmra.mrb[76].mxu1 %v2410_v57 }
 0x2c0   : > { %v2413_v39 = vmul.f32 %v3078_v31, %v1011_v26  ;;  %v1452_v27 = vpop.f32.mrb[48].mxu1 }
 0x2c1   : > { %v3079_v45 = vadd.f32 %v4388_v33, %v1452_v27  ;;  %v1454_v38 = vpop.f32.mrb[49].mxu1  ;;  %v1023_v33 = vadd.f32 %v4446_v7, %v4493_v43 }
 0x2c2   : > { %v3080_v15 = vadd.f32 %v4390_v60, %v1454_v38  ;;  %2549 = vmatprep.mubr.f32.mxu1 %v2413_v39  ;;  %v1051_v39 = vadd.f32 %v4464_v12, %v4489_v53  ;;  %v1057_v38 = vadd.f32 %v4468_v30, %v4489_v53  ;;  %v4688_v30 = vld [vmem:[#allocation14_spill] sm:$0xff] }
 0x2c3   : > { %v2414_v63 = vmul.f32 %v3079_v45, %v1015_v35  ;;  %2550 = vmatmul.mubr.f32.gmra.mrb[78].mxu1 %v2412_v36 }
 0x2c4   : > { %v2415_v0 = vmul.f32 %v3080_v15, %v1017_v16  ;;  %v1458_v46 = vpop.f32.mrb[50].mxu1 }
 0x2c5   : > { %v3081_v3 = vadd.f32 %v4392_v49, %v1458_v46  ;;  %v1460_v56 = vpop.f32.mrb[51].mxu1  ;;  %v1029_v49 = vadd.f32 %v4450_v19, %v4493_v43 }
 0x2c6   : > { %v3082_v2 = vadd.f32 %v4394_v52, %v1460_v56  ;;  %2554 = vmatprep.mubr.f32.mxu1 %v2415_v0  ;;  %v4686_v0 = vld [vmem:[#allocation13_spill] sm:$0xff] }
 0x2c7   : > { %v2416_v23 = vmul.f32 %v3081_v3, %v1021_v48  ;;  %2555 = vmatmul.mubr.f32.gmra.mrb[80].mxu1 %v2414_v63  ;;  %v1063_v46 = vadd.f32 %v4686_v0, %v4489_v53  ;;  %v4687_v48 = vld [vmem:[#allocation5_spill] sm:$0xff] }
 0x2c8   : > { %v2417_v60 = vmul.f32 %v3082_v2, %v1023_v33  ;;  %v1464_v29 = vpop.f32.mrb[52].mxu1  ;;  %v4689_v33 = vld [vmem:[#allocation6_spill] sm:$0xff] }
 0x2c9   : > { %v3083_v8 = vadd.f32 %v4396_v61, %v1464_v29  ;;  %v1466_v24 = vpop.f32.mrb[53].mxu1  ;;  %v1035_v61 = vadd.f32 %v4454_v54, %v4493_v43 }
 0x2ca   : > { %v3084_v6 = vadd.f32 %v4398_v14, %v1466_v24  ;;  %2559 = vmatprep.mubr.f32.mxu1 %v2417_v60  ;;  %v4690_v60 = vld [vmem:[#allocation15_spill] sm:$0xff] }
 0x2cb   : > { %v2418_v7 = vmul.f32 %v3083_v8, %v1027_v1  ;;  %2560 = vmatmul.mubr.f32.gmra.mrb[82].mxu1 %v2416_v23  ;;  %v1069_v29 = vadd.f32 %v4690_v60, %v4489_v53  ;;  %v4691_v1 = vld [vmem:[#allocation7_spill] sm:$0xff] }
 0x2cc   : > { %v2419_v52 = vmul.f32 %v3084_v6, %v1029_v49  ;;  %v1470_v22 = vpop.f32.mrb[54].mxu1  ;;  %v4692_v49 = vld [vmem:[#allocation16_spill] sm:$0xff] }
 0x2cd   : > { %v3085_v4 = vadd.f32 %v4400_v20, %v1470_v22  ;;  %v1472_v40 = vpop.f32.mrb[55].mxu1  ;;  %v1041_v20 = vadd.f32 %v4458_v62, %v4493_v43  ;;  %v1071_v6 = vadd.f32 %v4692_v49, %v4493_v43 }
 0x2ce   : > { %v3086_v17 = vadd.f32 %v4402_v59, %v1472_v40  ;;  %2564 = vmatprep.mubr.f32.mxu1 %v2419_v52  ;;  %v4694_v40 = vld [vmem:[#allocation17_spill] sm:$0xff] }
 0x2cf   : > { %v2420_v19 = vmul.f32 %v3085_v4, %v1033_v58  ;;  %2565 = vmatmul.mubr.f32.gmra.mrb[84].mxu1 %v2418_v7  ;;  %v4693_v7 = vld [vmem:[#allocation8_spill] sm:$0xff] }
 0x2d0   : > { %v2421_v14 = vmul.f32 %v3086_v17, %v1035_v61  ;;  %v1476_v57 = vpop.f32.mrb[56].mxu1  ;;  %v1075_v61 = vadd.f32 %v4694_v40, %v4489_v53  ;;  %v4695_v17 = vld [vmem:[#allocation9_spill] sm:$0xff] }
 0x2d1   : > { %v3087_v44 = vadd.f32 %v4404_v10, %v1476_v57  ;;  %v1478_v47 = vpop.f32.mrb[57].mxu1  ;;  %v1047_v10 = vadd.f32 %v4462_v9, %v4493_v43  ;;  %v4696_v57 = vld [vmem:[#allocation18_spill] sm:$0xff] }
 0x2d2   : > { %v3088_v55 = vadd.f32 %v4406_v21, %v1478_v47  ;;  %2569 = vmatprep.mubr.f32.mxu1 %v2421_v14 }
 0x2d3   : > { %v2422_v54 = vmul.f32 %v3087_v44, %v1039_v11  ;;  %2570 = vmatmul.mubr.f32.gmra.mrb[86].mxu1 %v2420_v19  ;;  %v1077_v11 = vadd.f32 %v4696_v57, %v4493_v43  ;;  %v4697_v44 = vld [vmem:[#allocation10_spill] sm:$0xff] }
 0x2d4   : > { %v2423_v59 = vmul.f32 %v3088_v55, %v1041_v20  ;;  %v1482_v13 = vpop.f32.mrb[58].mxu1 }
 0x2d5   : > { %v3089_v26 = vadd.f32 %v4408_v41, %v1482_v13  ;;  %v1484_v31 = vpop.f32.mrb[59].mxu1  ;;  %v1053_v41 = vadd.f32 %v4466_v34, %v4493_v43 }
 0x2d6   : > { %v3090_v32 = vadd.f32 %v4410_v5, %v1484_v31  ;;  %2574 = vmatprep.mubr.f32.mxu1 %v2423_v59  ;;  %v4698_v59 = vld [vmem:[#allocation19_spill] sm:$0xff] }
 0x2d7   : > { %v2424_v62 = vmul.f32 %v3089_v26, %v1045_v28  ;;  %2575 = vmatmul.mubr.f32.gmra.mrb[88].mxu1 %v2422_v54  ;;  %v1081_v13 = vadd.f32 %v4698_v59, %v4489_v53  ;;  %v4699_v28 = vld [vmem:[#allocation11_spill] sm:$0xff] }
 0x2d8   : > { %v2425_v21 = vmul.f32 %v3090_v32, %v1047_v10  ;;  %v1488_v36 = vpop.f32.mrb[60].mxu1  ;;  %v4700_v10 = vld [vmem:[#allocation20_spill] sm:$0xff] }
 0x2d9   : > { %v3091_v27 = vadd.f32 %v4412_v50, %v1488_v36  ;;  %v1490_v35 = vpop.f32.mrb[61].mxu1  ;;  %v1059_v50 = vadd.f32 %v4470_v18, %v4493_v43  ;;  %v1083_v32 = vadd.f32 %v4700_v10, %v4493_v43 }
 0x2da   : > { %v3092_v25 = vadd.f32 %v4414_v51, %v1490_v35  ;;  %2579 = vmatprep.mubr.f32.mxu1 %v2425_v21 }
 0x2db   : > { %v2426_v9 = vmul.f32 %v3091_v27, %v1051_v39  ;;  %2580 = vmatmul.mubr.f32.gmra.mrb[90].mxu1 %v2424_v62  ;;  %v4701_v62 = vld [vmem:[#allocation12_spill] sm:$0xff] }
 0x2dc   : > { %v2427_v5 = vmul.f32 %v3092_v25, %v1053_v41  ;;  %v1494_v45 = vpop.f32.mrb[62].mxu1 }
 0x2dd   : > { %v3093_v16 = vadd.f32 %v4416_v42, %v1494_v45  ;;  %v1496_v15 = vpop.f32.mrb[63].mxu1  ;;  %v1065_v42 = vadd.f32 %v4688_v30, %v4493_v43 }
 0x2de   : > { %v3094_v12 = vadd.f32 %v4418_v37, %v1496_v15  ;;  %2584 = vmatprep.mubr.f32.mxu1 %v2427_v5 }
 0x2df   : > { %v2428_v34 = vmul.f32 %v3093_v16, %v1057_v38  ;;  %2585 = vmatmul.mubr.f32.gmra.mrb[92].mxu1 %v2426_v9 }
 0x2e0   : > { %v2429_v51 = vmul.f32 %v3094_v12, %v1059_v50  ;;  %v1500_v63 = vpop.f32.mrb[64].mxu1 }
 0x2e1   : > { %v3095_v3 = vadd.f32 %v4687_v48, %v1500_v63  ;;  %v1502_v56 = vpop.f32.mrb[65].mxu1 }
 0x2e2   : > { %v3096_v2 = vadd.f32 %v4689_v33, %v1502_v56  ;;  %2589 = vmatprep.mubr.f32.mxu1 %v2429_v51 }
 0x2e3   : > { %v2430_v18 = vmul.f32 %v3095_v3, %v1063_v46  ;;  %2590 = vmatmul.mubr.f32.gmra.mrb[94].mxu1 %v2428_v34 }
 0x2e4   : > { %v2431_v37 = vmul.f32 %v3096_v2, %v1065_v42  ;;  %v1506_v23 = vpop.f32.mrb[66].mxu1 }
 0x2e5   : > { %v3097_v8 = vadd.f32 %v4691_v1, %v1506_v23  ;;  %v1508_v24 = vpop.f32.mrb[67].mxu1 }
 0x2e6   : > { %v3098_v52 = vadd.f32 %v4693_v7, %v1508_v24  ;;  %2594 = vmatprep.mubr.f32.mxu1 %v2431_v37 }
 0x2e7   : > { %v2432_v22 = vmul.f32 %v3097_v8, %v1069_v29  ;;  %2595 = vmatmul.mubr.f32.gmra.mrb[96].mxu1 %v2430_v18 }
 0x2e8   : > { %v2433_v58 = vmul.f32 %v3098_v52, %v1071_v6  ;;  %v1512_v4 = vpop.f32.mrb[68].mxu1 }
 0x2e9   : > { %v3099_v19 = vadd.f32 %v4695_v17, %v1512_v4  ;;  %v1514_v14 = vpop.f32.mrb[69].mxu1 }
 0x2ea   : > { %v3100_v47 = vadd.f32 %v4697_v44, %v1514_v14  ;;  %2599 = vmatprep.mubr.f32.mxu1 %v2433_v58 }
 0x2eb   : > { %v2434_v20 = vmul.f32 %v3099_v19, %v1075_v61  ;;  %2600 = vmatmul.mubr.f32.gmra.mrb[98].mxu1 %v2432_v22 }
 0x2ec   : > { %v2435_v55 = vmul.f32 %v3100_v47, %v1077_v11  ;;  %v1518_v54 = vpop.f32.mrb[70].mxu1 }
 0x2ed   : > { %v3101_v26 = vadd.f32 %v4699_v28, %v1518_v54  ;;  %v1520_v31 = vpop.f32.mrb[71].mxu1 }
 0x2ee   : > { %v3102_v21 = vadd.f32 %v4701_v62, %v1520_v31  ;;  %2604 = vmatprep.mubr.f32.mxu1 %v2435_v55 }
 0x2ef   : > { %v2436_v36 = vmul.f32 %v3101_v26, %v1081_v13  ;;  %2605 = vmatmul.mubr.f32.gmra.mrb[100].mxu1 %v2434_v20 }
 0x2f0   : > { %v2437_v39 = vmul.f32 %v3102_v21, %v1083_v32 }
 0x2f2   : > { %2609 = vmatprep.mubr.f32.mxu1 %v2437_v39 }
 0x2f3   : > { %2610 = vmatmul.mubr.f32.gmra.mrb[102].mxu1 %v2436_v36 }
 0x38a   : > { %v2923_v27 = vpop.f32.mrb[72].mxu1 }
 0x38b   : > { %v2924_v35 = vpop.f32.mrb[73].mxu1 }
 0x38c   : > { %v2925_v53 = vadd.f32 %v2924_v35, %v2923_v27 }
 0x38e   : > { %2615 = vst [vmem:[%s4588_s24] sm:$0xff] %v2925_v53  ;;  %v2926_v43 = vpop.f32.mrb[74].mxu1 }
 0x38f   : > { %v2927_v41 = vpop.f32.mrb[75].mxu1 }
 0x390   : > { %v2928_v25 = vadd.f32 %v2927_v41, %v2926_v43 }
 0x392   : > { %2616 = vst [vmem:[%s4588_s24 + $0x8] sm:$0xff] %v2928_v25  ;;  %v2929_v9 = vpop.f32.mrb[76].mxu1 }
 0x393   : > { %v2930_v5 = vpop.f32.mrb[77].mxu1 }
 0x394   : > { %v2931_v45 = vadd.f32 %v2930_v5, %v2929_v9 }
 0x396   : > { %2617 = vst [vmem:[%s4588_s24 + $0x10] sm:$0xff] %v2931_v45  ;;  %v2932_v38 = vpop.f32.mrb[78].mxu1 }
 0x397   : > { %v2933_v16 = vpop.f32.mrb[79].mxu1 }
 0x398   : > { %v2934_v15 = vadd.f32 %v2933_v16, %v2932_v38 }
 0x39a   : > { %2618 = vst [vmem:[%s4588_s24 + $0x18] sm:$0xff] %v2934_v15  ;;  %v2935_v50 = vpop.f32.mrb[80].mxu1 }
 0x39b   : > { %v2936_v12 = vpop.f32.mrb[81].mxu1 }
 0x39c   : > { %v2937_v34 = vadd.f32 %v2936_v12, %v2935_v50 }
 0x39e   : > { %2619 = vst [vmem:[%s4588_s24 + $0x20] sm:$0xff] %v2937_v34  ;;  %v2938_v51 = vpop.f32.mrb[82].mxu1 }
 0x39f   : > { %v2939_v63 = vpop.f32.mrb[83].mxu1 }
 0x3a0   : > { %v2940_v0 = vadd.f32 %v2939_v63, %v2938_v51 }
 0x3a2   : > { %2620 = vst [vmem:[%s4588_s24 + $0x28] sm:$0xff] %v2940_v0  ;;  %v2941_v46 = vpop.f32.mrb[84].mxu1 }
 0x3a3   : > { %v2942_v48 = vpop.f32.mrb[85].mxu1 }
 0x3a4   : > { %v2943_v3 = vadd.f32 %v2942_v48, %v2941_v46 }
 0x3a6   : > { %2621 = vst [vmem:[%s4588_s24 + $0x30] sm:$0xff] %v2943_v3  ;;  %v2944_v56 = vpop.f32.mrb[86].mxu1 }
 0x3a7   : > { %v2945_v30 = vpop.f32.mrb[87].mxu1 }
 0x3a8   : > { %v2946_v42 = vadd.f32 %v2945_v30, %v2944_v56 }
 0x3aa   : > { %2622 = vst [vmem:[%s4588_s24 + $0x38] sm:$0xff] %v2946_v42  ;;  %v2947_v33 = vpop.f32.mrb[88].mxu1 }
 0x3ab   : > { %v2948_v2 = vpop.f32.mrb[89].mxu1 }
 0x3ac   : > { %v2949_v18 = vadd.f32 %v2948_v2, %v2947_v33 }
 0x3ae   : > { %2623 = vst [vmem:[%s4588_s24 + $0x40] sm:$0xff] %v2949_v18  ;;  %v2950_v37 = vpop.f32.mrb[90].mxu1 }
 0x3af   : > { %v2951_v23 = vpop.f32.mrb[91].mxu1 }
 0x3b0   : > { %v2952_v60 = vadd.f32 %v2951_v23, %v2950_v37 }
 0x3b2   : > { %2624 = vst [vmem:[%s4588_s24 + $0x48] sm:$0xff] %v2952_v60  ;;  %v2953_v29 = vpop.f32.mrb[92].mxu1 }
 0x3b3   : > { %v2954_v1 = vpop.f32.mrb[93].mxu1 }
 0x3b4   : > { %v2955_v8 = vadd.f32 %v2954_v1, %v2953_v29 }
 0x3b6   : > { %2625 = vst [vmem:[%s4588_s24 + $0x50] sm:$0xff] %v2955_v8  ;;  %v2956_v24 = vpop.f32.mrb[94].mxu1 }
 0x3b7   : > { %v2957_v49 = vpop.f32.mrb[95].mxu1 }
 0x3b8   : > { %v2958_v6 = vadd.f32 %v2957_v49, %v2956_v24 }
 0x3ba   : > { %2626 = vst [vmem:[%s4588_s24 + $0x58] sm:$0xff] %v2958_v6  ;;  %v2959_v7 = vpop.f32.mrb[96].mxu1 }
 0x3bb   : > { %v2960_v52 = vpop.f32.mrb[97].mxu1 }
 0x3bc   : > { %v2961_v22 = vadd.f32 %v2960_v52, %v2959_v7 }
 0x3be   : > { %2627 = vst [vmem:[%s4588_s24 + $0x60] sm:$0xff] %v2961_v22  ;;  %v2962_v58 = vpop.f32.mrb[98].mxu1 }
 0x3bf   : > { %v2963_v4 = vpop.f32.mrb[99].mxu1 }
 0x3c0   : > { %v2964_v40 = vadd.f32 %v2963_v4, %v2962_v58 }
 0x3c2   : > { %2628 = vst [vmem:[%s4588_s24 + $0x68] sm:$0xff] %v2964_v40  ;;  %v2965_v61 = vpop.f32.mrb[100].mxu1 }
 0x3c3   : > { %v2966_v17 = vpop.f32.mrb[101].mxu1 }
 0x3c4   : > { %v2967_v19 = vadd.f32 %v2966_v17, %v2965_v61 }
 0x3c6   : > { %2629 = vst [vmem:[%s4588_s24 + $0x70] sm:$0xff] %v2967_v19  ;;  %v2968_v14 = vpop.f32.mrb[102].mxu1 }
 0x3c7   : > { %v2969_v57 = vpop.f32.mrb[103].mxu1 }
 0x3c8   : > { %v2970_v11 = vadd.f32 %v2969_v57, %v2968_v14 }
 0x3ca   : > { %2630 = vst [vmem:[%s4588_s24 + $0x78] sm:$0xff] %v2970_v11 }
 0x3cb   : > { %3282 = shalt.err (!%p3279_p3)
}
 0x3cc   : > { %s3283_s17 = scalar_lea.hbm %s4610_s27, 2048  ;;  %s3287_s22 = scalar_lea.hbm %s4667_s9, 4096 }
 0x3cd   : > { %p3284_p4 = scmp.ne.s32.totalorder %s4610_s27, %s3283_s17  ;;  %p3288_p9 = scmp.lt.u32.totalorder %s4610_s27, %s4667_s9 }
 0x3ce   : > { %p3289_p10 = scmp.lt.u32.totalorder %s3287_s22, %s3283_s17  ;;  %p3291_p12 = scmp.lt.u32.totalorder %s3283_s17, %s4610_s27 }
 0x3cf   : > { %p3285_p7 = pnand %p3284_p4, %p3429_p5 }
 0x3d0   : > { %p3290_p11 = por %p3289_p10, %p3288_p9 }
 0x3d1   : > { %p3286_p8 = pneg %p3285_p7 }
 0x3d2   : > { %p3292_p13 = por %p3291_p12, %p3290_p11 }
 0x3d4   : > { %p3293_p0 = pnand %p3292_p13, %p3286_p8 }
 0x3d6   : > { %3296 = shalt.err (!%p3293_p0)
}
 0x3d7   : > { %s3339_s13 = smov 128   ;;  %s3340_s29 = smov 8  }
 0x3d8   : > { %3167 = dma.vmem_to_hbm [thread:$0]  (%p3429_p5), %s4612_s21, 2048, %s4610_s27, %s4617_s28, %s3339_s13, %s3339_s13, %s3340_s29  }
 0x3d9 PF: > { %p3173_p1 = scmp.ge.s32.totalorder %s3331_s12, 2  ;;  %s2660_s14 = sand.u32 1, %s3319_s30  }
 0x3da   : > { %s2661_s16 = scalar_lea.sflag [#allocation3], %s2660_s14 }
 0x3db   : > { %p3170_p2 = pnand %p3173_p1, %p3433_p6 }
 0x3dd   : > { %3314 = dma.done.wait (!%p3170_p2), %s2661_s16, 2048  }
 0x3de   : > { %3316 = vsyncadd (!%p3170_p2), %s2661_s16, 4294965248  ;;  %p19_p3 = scmp.ge.s32.totalorder %s3416_s15, 4   ;;  %s4702_s30 = smov %s3323_s10 }
 0x3df   : > { %s4703_s10 = smov %s3327_s11  ;;  %s4704_s11 = smov %s3427_s18 }
 0x3e0   : > { %s4705_s12 = smov %s3416_s15  ;;  %21 = sbr.rel (!%p19_p3) target bundleno = 3 (0x3), region = 100 }
 0x3e7   :  { %2666 = vsyncpa [#allocation3], 1 }
 0x3e8   :  { %2668 = vsyncpa [#allocation3 + $0x1], 1 }

</bundles_post_ra>
